<compile_context>
chip_gen: v7x
topology: tpu7x:2x2x1
jax: 0.10.0
libtpu: 0.0.40
codegen_flags: <defaults>
</compile_context>

<pallas_src>
import functools

import jax
import jax.numpy as jnp
import numpy as np
from jax.experimental import pallas as pl
from jax.experimental.pallas import tpu as pltpu


def _rwkv_kernel(x_ref, state_ref, mix_r_ref, mix_k_ref, mix_v_ref,
                 wr_ref, wk_ref, wv_ref, wo_ref, td_ref,
                 out_ref, new_state_ref,
                 carry_s_ref, carry_x_ref,
                 *, t_chunk, block_b, att_scale):
    # x_ref:        (Bb, Tc, C)  batch x time-chunk block
    # state_ref:    (Bb, 1, C)   module's initial recurrent state
    # mix_*_ref:    (1, C)       time-mix coefficients
    # w*_ref:       (C, C)       pre-transposed weights (y = x @ W), maybe bf16
    # td_ref:       (1, C)       raw time_decay (exp applied in-kernel)
    # carry_s_ref:  (Bb, 1, C)   recurrent state carried across T-chunks
    # carry_x_ref:  (Bb, 1, C)   previous token carried across T-chunks
    Tc, Bb = t_chunk, block_b
    C = x_ref.shape[-1]
    R = Bb * Tc
    cdt = wr_ref.dtype                       # MXU input dtype (bf16 or f32)
    tci = pl.program_id(1)

    # First chunk of this batch block: both carries start from `state`.
    @pl.when(tci == 0)
    def _():
        s0 = state_ref[...].astype(jnp.float32)
        carry_s_ref[...] = s0
        carry_x_ref[...] = s0

    prev_x = carry_x_ref[...]                # token-shift input for row 0
    prev_s = carry_s_ref[...]                # recurrent state entering the chunk

    x3 = x_ref[...].astype(jnp.float32)      # (Bb, Tc, C)
    last_x = x3[:, Tc - 1:Tc, :]
    carry_x_ref[...] = last_x                # token-shift carry for next chunk

    # new_state = last input token of each sequence (written early, last chunk).
    @pl.when(tci == pl.num_programs(1) - 1)
    def _():
        new_state_ref[...] = last_x.astype(new_state_ref.dtype)

    x = x3.reshape(R, C)                     # flattened rows for the matmuls

    # Per-row local timestep index as a (R, 1) column vector (lane-broadcast).
    tloc = jax.lax.broadcasted_iota(jnp.int32, (Bb, Tc, 1), 1).reshape(R, 1)
    row0 = tloc == 0

    # Token shift: x_mix[b, t] = x[b, t-1] for t>0, carry_x[b] for t==0.
    # The circular roll over flattened rows is fine: every t==0 row (where the
    # roll wraps across a batch boundary) is overwritten with the carry below.
    x_prev = pltpu.roll(x, shift=1, axis=0)
    prev_x_rows = jnp.broadcast_to(prev_x, (Bb, Tc, C)).reshape(R, C)
    x_mix = jnp.where(row0, prev_x_rows, x_prev)

    # Shared token-shift delta (one sub, then one mul/add per branch).
    delta = x_mix - x
    xr = x + (1.0 - mix_r_ref[...]) * delta
    xk = x + (1.0 - mix_k_ref[...]) * delta
    xv = x + (1.0 - mix_v_ref[...]) * delta

    # Projections on the MXU (f32 accumulation; inputs cast at the MXU boundary).
    r = jax.nn.sigmoid(jnp.dot(xr.astype(cdt), wr_ref[...],
                               preferred_element_type=jnp.float32))
    k = jnp.exp(jnp.dot(xk.astype(cdt), wk_ref[...],
                        preferred_element_type=jnp.float32))
    v = jnp.dot(xv.astype(cdt), wv_ref[...], preferred_element_type=jnp.float32)
    if att_scale != 1.0:
        r = r * att_scale                    # fold att_scale once

    time_decay = jnp.exp(td_ref[...].astype(jnp.float32))    # (1, C)
    kv = k * v                               # (R, C)

    # Fold the carried state into row 0 of each batch: b'_0 = d*prev_s + kv_0,
    # so s_t = sum_{i<=t} d^(t-i) * b'_i within the chunk.
    prev_s_rows = jnp.broadcast_to(prev_s, (Bb, Tc, C)).reshape(R, C)
    bvec = kv + jnp.where(row0, time_decay * prev_s_rows, 0.0)

    # Hillis-Steele scan over the (chunk-local) time axis, per batch.
    # Mask the PRODUCT: if dpow = d^off overflows to +inf, masking `shifted`
    # first would give inf * 0 = NaN on rows t < off; jnp.where on the product
    # discards those lanes instead (matches the serial recurrence).
    dpow = time_decay                        # d^off for the current step
    off = 1
    while off < Tc:
        shifted = pltpu.roll(bvec, shift=off, axis=0)
        bvec = bvec + jnp.where(tloc >= off, dpow * shifted, 0.0)
        dpow = dpow * dpow
        off *= 2
    s = bvec                                 # (R, C): recurrent state at every t

    # State carried into the next chunk = state after this chunk's last step.
    carry_s_ref[...] = s.reshape(Bb, Tc, C)[:, Tc - 1:Tc, :]

    att = (r * s).astype(cdt)
    out = jnp.dot(att, wo_ref[...], preferred_element_type=jnp.float32)
    out_ref[...] = out.reshape(Bb, Tc, C).astype(out_ref.dtype)


def _vmem_capacity_bytes():
    """Physical VMEM per TensorCore; conservative fallback if query fails."""
    try:
        info = pltpu.get_tpu_info()
        cap = getattr(info, "vmem_capacity_bytes", None)
        if cap:
            return int(cap)
    except Exception:
        pass
    return 64 << 20      # v7x per-TC VMEM — safe lower bound everywhere


def _pick_blocks(B, T, C, *, capacity_bytes, weight_bytes):
    """Capacity/weight-aware (block_b, t_chunk) picker.

    Targets ~512 MXU rows on 128 MiB parts (v5e/v6e), ~256 on 64 MiB parts
    (v7x), prefers B//block_b >= 2 so both v7x TensorCores get work, and keeps
    live intermediates + double-buffered x/out within what's left after the
    resident weights.
    """
    target_rows = 512 if capacity_bytes >= (96 << 20) else 256
    budget = max(capacity_bytes - (8 << 20) - weight_bytes, 4 << 20)
    bytes_per_row = 80 * C              # ~16 live f32 temps + 2x-buffered x/out
    max_rows = max(8, budget // bytes_per_row)

    # t_chunk must divide T and be a multiple of 8 (sublane tiling) or == T.
    t_chunks = [tc for tc in range(T, 0, -1)
                if T % tc == 0 and (tc == T or tc % 8 == 0)]
    batch_blocks = sorted((d for d in range(1, B + 1) if B % d == 0),
                          reverse=True)

    def score(bb, tc):
        rows = bb * tc
        fits = rows <= max_rows
        split = (B // bb) >= 2 or B < 2      # keep both v7x cores busy
        fills = min(rows, target_rows)
        return (fits, split, fills, -rows)   # fit > split > fill, then smallest

    return max(((bb, tc) for bb in batch_blocks for tc in t_chunks),
               key=lambda p: score(*p))


def _vmem_limit_bytes(rows, block_b, C, weight_buf_bytes, capacity_bytes):
    io = 4 * rows * C * 4                        # x + out, double-buffered
    small = 6 * block_b * C * 4 + 20 * C * 4     # state/new_state/carries, mixes/decay
    work = 16 * rows * C * 4                     # live f32 intermediates headroom
    est = weight_buf_bytes + io + small + work + (2 << 20)
    return int(min(max(est, 16 << 20), capacity_bytes - (8 << 20)))


def rwkv_time_first(x, state, params, *, att_scale=1.0,
                    mxu_dtype=jnp.bfloat16, out_dtype=None,
                    block_b=None, t_chunk=None):
    """x: [B, T, C] f32, state: [B, C] f32 -> (output [B, T, C], new_state [B, C])."""
    B, T, C = x.shape
    if out_dtype is None:
        out_dtype = x.dtype
    capacity = _vmem_capacity_bytes()
    w_item = jnp.dtype(mxu_dtype).itemsize

    if block_b is None or t_chunk is None:
        bb, tc = _pick_blocks(B, T, C, capacity_bytes=capacity,
                              weight_bytes=4 * C * C * w_item)
        block_b = bb if block_b is None else block_b
        t_chunk = tc if t_chunk is None else t_chunk
    assert B % block_b == 0, "block_b must divide B"
    assert T % t_chunk == 0, "t_chunk must divide T"
    assert t_chunk == T or t_chunk % 8 == 0, "t_chunk must be T or a multiple of 8"

    state3 = state.reshape(B, 1, C)

    # Pre-transpose weights (y = x @ W) and cast once so the VMEM-resident
    # copies are already in the MXU input dtype.
    wr = params["wr"].T.astype(mxu_dtype)
    wk = params["wk"].T.astype(mxu_dtype)
    wv = params["wv"].T.astype(mxu_dtype)
    wo = params["wo"].T.astype(mxu_dtype)

    kernel = functools.partial(_rwkv_kernel, t_chunk=t_chunk, block_b=block_b,
                               att_scale=att_scale)
    rows = block_b * t_chunk
    grid = (B // block_b, T // t_chunk)

    def call(single_buffer_consts):
        nbuf = 1 if single_buffer_consts else 2
        weight_buf = 4 * C * C * w_item * nbuf
        limit = _vmem_limit_bytes(rows, block_b, C, weight_buf, capacity)

        def const_spec(shape):
            n = len(shape)
            if single_buffer_consts:
                return pl.BlockSpec(shape, lambda b, t, n=n: (0,) * n,
                                    pipeline_mode=pl.Buffered(1))
            return pl.BlockSpec(shape, lambda b, t, n=n: (0,) * n)

        return pl.pallas_call(
            kernel,
            out_shape=(
                jax.ShapeDtypeStruct((B, T, C), out_dtype),
                jax.ShapeDtypeStruct((B, 1, C), x.dtype),
            ),
            grid_spec=pltpu.PrefetchScalarGridSpec(
                num_scalar_prefetch=0,
                grid=grid,
                in_specs=[
                    pl.BlockSpec((block_b, t_chunk, C), lambda b, t: (b, t, 0)),  # x
                    pl.BlockSpec((block_b, 1, C), lambda b, t: (b, 0, 0)),        # state
                    const_spec((1, C)),    # time_mix_r
                    const_spec((1, C)),    # time_mix_k
                    const_spec((1, C)),    # time_mix_v
                    const_spec((C, C)),    # Wr^T
                    const_spec((C, C)),    # Wk^T
                    const_spec((C, C)),    # Wv^T
                    const_spec((C, C)),    # Wo^T
                    const_spec((1, C)),    # time_decay
                ],
                out_specs=(
                    pl.BlockSpec((block_b, t_chunk, C), lambda b, t: (b, t, 0)),
                    pl.BlockSpec((block_b, 1, C), lambda b, t: (b, 0, 0)),
                ),
                scratch_shapes=[
                    pltpu.VMEM((block_b, 1, C), jnp.float32),   # carry_s
                    pltpu.VMEM((block_b, 1, C), jnp.float32),   # carry_x
                ],
            ),
            compiler_params=pltpu.CompilerParams(
                dimension_semantics=("parallel", "arbitrary"),
                vmem_limit_bytes=limit),
        )(
            x, state3,
            params["time_mix_r"], params["time_mix_k"], params["time_mix_v"],
            wr, wk, wv, wo,
            params["time_decay"],
        )

    try:
        out, new_state = call(True)        # single-buffered constants
    except Exception:
        out, new_state = call(False)       # fallback: default double-buffering
    return out, new_state.reshape(B, C)


def rwkv_reference(x, state, params, *, att_scale=1.0, mxu_dtype=jnp.float32):
    """Pure-JAX reference matching the PyTorch forward (linear attention path)."""
    B, T, C = x.shape
    x_mix = jnp.concatenate([state[:, None, :], x[:, :-1]], axis=1)
    mr, mk, mv = params["time_mix_r"], params["time_mix_k"], params["time_mix_v"]
    xr = x * mr + x_mix * (1.0 - mr)
    xk = x * mk + x_mix * (1.0 - mk)
    xv = x * mv + x_mix * (1.0 - mv)

    def mm(a, w):   # module layout: y = a @ w.T
        return jnp.einsum("btc,dc->btd", a.astype(mxu_dtype), w.astype(mxu_dtype),
                          preferred_element_type=jnp.float32)

    r = jax.nn.sigmoid(mm(xr, params["wr"]))
    k = jnp.exp(mm(xk, params["wk"]))
    v = mm(xv, params["wv"])
    td = jnp.exp(params["time_decay"])          # (1, C)
    kv = k * v
    s = state
    outs = []
    for t in range(T):
        s = s * td + kv[:, t]
        outs.append(r[:, t] * s)
    att = jnp.stack(outs, axis=1) * att_scale
    out = jnp.einsum("btc,dc->btd", att.astype(mxu_dtype),
                     params["wo"].astype(mxu_dtype),
                     preferred_element_type=jnp.float32)
    return out, x[:, -1]


def make_params(key, hidden_size, layer_id=0, time_mix_ratio=0.5):
    std = 0.02 * (layer_id + 1)
    ks = jax.random.split(key, 4)
    C = hidden_size
    decay_base = 0.9 ** (layer_id + 1)
    return {
        "time_mix_r": jnp.full((1, C), time_mix_ratio, jnp.float32),
        "time_mix_k": jnp.full((1, C), time_mix_ratio, jnp.float32),
        "time_mix_v": jnp.full((1, C), time_mix_ratio, jnp.float32),
        "wr": std * jax.random.normal(ks[0], (C, C), jnp.float32),
        "wk": std * jax.random.normal(ks[1], (C, C), jnp.float32),
        "wv": std * jax.random.normal(ks[2], (C, C), jnp.float32),
        "wo": std * jax.random.normal(ks[3], (C, C), jnp.float32),
        "time_decay": jnp.full((1, C), decay_base, jnp.float32),
    }


if __name__ == "__main__":
    att_scale = 1.0
    key = jax.random.PRNGKey(0)
    k_x, k_p, k_x2 = jax.random.split(key, 3)

    B, T, C = 2, 8, 32
    x = jax.random.normal(k_x, (B, T, C), jnp.float32)
    state = jnp.zeros((B, C), jnp.float32)       # state=None case in the module
    params = make_params(k_p, C, layer_id=0, time_mix_ratio=0.5)

    # Case 1: single T-chunk (t_chunk == T), full-f32 MXU path — tight check
    # against the PyTorch-equivalent reference (differences only from the
    # associative-scan reassociation).
    out32, ns32 = rwkv_time_first(x, state, params, att_scale=att_scale,
                                  mxu_dtype=jnp.float32)
    jax.block_until_ready((out32, ns32))
    ref32, refs = rwkv_reference(x, state, params, att_scale=att_scale,
                                 mxu_dtype=jnp.float32)
    assert out32.shape == (B, T, C) and ns32.shape == (B, C)
    np.testing.assert_allclose(np.asarray(out32), np.asarray(ref32),
                               rtol=1e-4, atol=1e-3)
    np.testing.assert_allclose(np.asarray(ns32), np.asarray(refs),
                               rtol=1e-6, atol=1e-6)

    # Case 2: multi-chunk carry path (t_chunk < T) and multi-batch block
    # (exercises the flattened-roll batch-boundary masking and chunk carries).
    T2 = 16
    x2 = jax.random.normal(k_x2, (B, T2, C), jnp.float32)
    out_c, ns_c = rwkv_time_first(x2, state, params, att_scale=att_scale,
                                  mxu_dtype=jnp.float32, block_b=2, t_chunk=8)
    jax.block_until_ready((out_c, ns_c))
    ref_c, refs_c = rwkv_reference(x2, state, params, att_scale=att_scale,
                                   mxu_dtype=jnp.float32)
    np.testing.assert_allclose(np.asarray(out_c), np.asarray(ref_c),
                               rtol=2e-3, atol=1e-2)
    np.testing.assert_allclose(np.asarray(ns_c), np.asarray(refs_c),
                               rtol=1e-6, atol=1e-6)

    # Case 3: default production path (bf16 at the MXU boundary, f32 elsewhere).
    out16, ns16 = rwkv_time_first(x, state, params, att_scale=att_scale)
    jax.block_until_ready((out16, ns16))
    ref16, _ = rwkv_reference(x, state, params, att_scale=att_scale,
                              mxu_dtype=jnp.bfloat16)
    np.testing.assert_allclose(np.asarray(out16), np.asarray(ref16),
                               rtol=1e-2, atol=1e-1)
    np.testing.assert_allclose(np.asarray(ns16), np.asarray(refs),
                               rtol=1e-6, atol=1e-6)

    print("KERNEL_OK")
</pallas_src>

<mosaic_0001>
module attributes {stable_mosaic.version = 11 : i64} {
  func.func @_rwkv_kernel(%arg0: i32, %arg1: i32, %arg2: memref<1x8x32xf32, #tpu.memory_space<vmem>>, %arg3: memref<1x1x32xf32, #tpu.memory_space<vmem>>, %arg4: memref<1x32xf32, #tpu.memory_space<vmem>>, %arg5: memref<1x32xf32, #tpu.memory_space<vmem>>, %arg6: memref<1x32xf32, #tpu.memory_space<vmem>>, %arg7: memref<32x32xf32, #tpu.memory_space<vmem>>, %arg8: memref<32x32xf32, #tpu.memory_space<vmem>>, %arg9: memref<32x32xf32, #tpu.memory_space<vmem>>, %arg10: memref<32x32xf32, #tpu.memory_space<vmem>>, %arg11: memref<1x32xf32, #tpu.memory_space<vmem>>, %arg12: memref<1x8x32xf32, #tpu.memory_space<vmem>>, %arg13: memref<1x1x32xf32, #tpu.memory_space<vmem>>, %arg14: memref<1x1x32xf32, #tpu.memory_space<vmem>>, %arg15: memref<1x1x32xf32, #tpu.memory_space<vmem>>) attributes {dimension_semantics = [#tpu.dimension_semantics<parallel>, #tpu.dimension_semantics<arbitrary>], iteration_bounds = array<i64: 2, 1>, scalar_prefetch = 0 : i64, scratch_operands = 2 : i64, tpu.core_type = #tpu.core_type<tc>, window_params = [{transform_indices = @transform_0, window_bounds = array<i64: 1, 8, 32>}, {transform_indices = @transform_1, window_bounds = array<i64: 1, 1, 32>}, {pipeline_mode = #tpu.pipeline_mode<synchronous>, transform_indices = @transform_2, window_bounds = array<i64: 1, 32>}, {pipeline_mode = #tpu.pipeline_mode<synchronous>, transform_indices = @transform_3, window_bounds = array<i64: 1, 32>}, {pipeline_mode = #tpu.pipeline_mode<synchronous>, transform_indices = @transform_4, window_bounds = array<i64: 1, 32>}, {pipeline_mode = #tpu.pipeline_mode<synchronous>, transform_indices = @transform_5, window_bounds = array<i64: 32, 32>}, {pipeline_mode = #tpu.pipeline_mode<synchronous>, transform_indices = @transform_6, window_bounds = array<i64: 32, 32>}, {pipeline_mode = #tpu.pipeline_mode<synchronous>, transform_indices = @transform_7, window_bounds = array<i64: 32, 32>}, {pipeline_mode = #tpu.pipeline_mode<synchronous>, transform_indices = @transform_8, window_bounds = array<i64: 32, 32>}, {pipeline_mode = #tpu.pipeline_mode<synchronous>, transform_indices = @transform_9, window_bounds = array<i64: 1, 32>}, {transform_indices = @transform_10, window_bounds = array<i64: 1, 8, 32>}, {transform_indices = @transform_11, window_bounds = array<i64: 1, 1, 32>}]} {
    %c0_i32 = arith.constant 0 : i32
    %0 = arith.cmpi eq, %arg1, %c0_i32 : i32
    %1 = arith.extui %0 : i1 to i32
    %c0_i32_0 = arith.constant 0 : i32
    %2 = arith.cmpi ne, %1, %c0_i32_0 : i32
    scf.if %2 {
      %c0_52 = arith.constant 0 : index
      %c0_53 = arith.constant 0 : index
      %c0_54 = arith.constant 0 : index
      %107 = vector.load %arg3[%c0_52, %c0_53, %c0_54] : memref<1x1x32xf32, #tpu.memory_space<vmem>>, vector<1x1x32xf32>
      %c0_55 = arith.constant 0 : index
      %c0_56 = arith.constant 0 : index
      %c0_57 = arith.constant 0 : index
      %108 = vector.load %arg14[%c0_55, %c0_56, %c0_57] : memref<1x1x32xf32, #tpu.memory_space<vmem>>, vector<1x1x32xf32>
      tpu.vector_store %arg14[%c0_55, %c0_56, %c0_57], %107 {strides = array<i32>} : memref<1x1x32xf32, #tpu.memory_space<vmem>>, vector<1x1x32xf32>,
      %c0_58 = arith.constant 0 : index
      %c0_59 = arith.constant 0 : index
      %c0_60 = arith.constant 0 : index
      %109 = vector.load %arg15[%c0_58, %c0_59, %c0_60] : memref<1x1x32xf32, #tpu.memory_space<vmem>>, vector<1x1x32xf32>
      tpu.vector_store %arg15[%c0_58, %c0_59, %c0_60], %107 {strides = array<i32>} : memref<1x1x32xf32, #tpu.memory_space<vmem>>, vector<1x1x32xf32>,
    } else {
    }
    %c0 = arith.constant 0 : index
    %c0_1 = arith.constant 0 : index
    %c0_2 = arith.constant 0 : index
    %3 = vector.load %arg15[%c0, %c0_1, %c0_2] : memref<1x1x32xf32, #tpu.memory_space<vmem>>, vector<1x1x32xf32>
    %c0_3 = arith.constant 0 : index
    %c0_4 = arith.constant 0 : index
    %c0_5 = arith.constant 0 : index
    %4 = vector.load %arg14[%c0_3, %c0_4, %c0_5] : memref<1x1x32xf32, #tpu.memory_space<vmem>>, vector<1x1x32xf32>
    %c0_6 = arith.constant 0 : index
    %c0_7 = arith.constant 0 : index
    %c0_8 = arith.constant 0 : index
    %5 = vector.load %arg2[%c0_6, %c0_7, %c0_8] : memref<1x8x32xf32, #tpu.memory_space<vmem>>, vector<1x8x32xf32>
    %6 = vector.extract_strided_slice %5 {offsets = [0, 7, 0], sizes = [1, 1, 32], strides = [1, 1, 1]} : vector<1x8x32xf32> to vector<1x1x32xf32>
    %c0_9 = arith.constant 0 : index
    %c0_10 = arith.constant 0 : index
    %c0_11 = arith.constant 0 : index
    %7 = vector.load %arg15[%c0_9, %c0_10, %c0_11] : memref<1x1x32xf32, #tpu.memory_space<vmem>>, vector<1x1x32xf32>
    tpu.vector_store %arg15[%c0_9, %c0_10, %c0_11], %6 {strides = array<i32>} : memref<1x1x32xf32, #tpu.memory_space<vmem>>, vector<1x1x32xf32>,
    %c0_i32_12 = arith.constant 0 : i32
    %8 = arith.cmpi eq, %arg1, %c0_i32_12 : i32
    %9 = arith.extui %8 : i1 to i32
    %c0_i32_13 = arith.constant 0 : i32
    %10 = arith.cmpi ne, %9, %c0_i32_13 : i32
    scf.if %10 {
      %c0_52 = arith.constant 0 : index
      %c0_53 = arith.constant 0 : index
      %c0_54 = arith.constant 0 : index
      %107 = vector.load %arg13[%c0_52, %c0_53, %c0_54] : memref<1x1x32xf32, #tpu.memory_space<vmem>>, vector<1x1x32xf32>
      tpu.vector_store %arg13[%c0_52, %c0_53, %c0_54], %6 {strides = array<i32>} : memref<1x1x32xf32, #tpu.memory_space<vmem>>, vector<1x1x32xf32>,
    } else {
    }
    %11 = vector.shape_cast %5 : vector<1x8x32xf32> to vector<8x32xf32>
    %12 = tpu.iota {dimensions = array<i32: 1>} : vector<1x8x1xi32>
    %13 = vector.shape_cast %12 : vector<1x8x1xi32> to vector<8x1xi32>
    %c0_i32_14 = arith.constant 0 : i32
    %14 = vector.broadcast %c0_i32_14 : i32 to vector<8x1xi32>
    %15 = arith.cmpi eq, %13, %14 : vector<8x1xi32>
    %c1_i32 = arith.constant 1 : i32
    %16 = tpu.dynamic_rotate %11 by %c1_i32 dim 0 : vector<8x32xf32>, i32 -> vector<8x32xf32>
    %17 = vector.shape_cast %3 : vector<1x1x32xf32> to vector<1x1x32xf32>
    %18 = vector.broadcast %17 : vector<1x1x32xf32> to vector<1x8x32xf32>
    %19 = vector.shape_cast %18 : vector<1x8x32xf32> to vector<8x32xf32>
    %20 = vector.shape_cast %15 : vector<8x1xi1> to vector<8x1xi1>
    %21 = vector.broadcast %20 : vector<8x1xi1> to vector<8x32xi1>
    %22 = arith.select %21, %19, %16 : vector<8x32xi1>, vector<8x32xf32>
    %23 = arith.subf %22, %11 : vector<8x32xf32>
    %c0_15 = arith.constant 0 : index
    %c0_16 = arith.constant 0 : index
    %24 = vector.load %arg4[%c0_15, %c0_16] : memref<1x32xf32, #tpu.memory_space<vmem>>, vector<1x32xf32>
    %cst = arith.constant 1.000000e+00 : f32
    %25 = vector.broadcast %cst : f32 to vector<1x32xf32>
    %26 = arith.subf %25, %24 : vector<1x32xf32>
    %27 = vector.broadcast %26 : vector<1x32xf32> to vector<8x32xf32>
    %28 = arith.mulf %27, %23 : vector<8x32xf32>
    %29 = arith.addf %11, %28 : vector<8x32xf32>
    %c0_17 = arith.constant 0 : index
    %c0_18 = arith.constant 0 : index
    %30 = vector.load %arg5[%c0_17, %c0_18] : memref<1x32xf32, #tpu.memory_space<vmem>>, vector<1x32xf32>
    %cst_19 = arith.constant 1.000000e+00 : f32
    %31 = vector.broadcast %cst_19 : f32 to vector<1x32xf32>
    %32 = arith.subf %31, %30 : vector<1x32xf32>
    %33 = vector.broadcast %32 : vector<1x32xf32> to vector<8x32xf32>
    %34 = arith.mulf %33, %23 : vector<8x32xf32>
    %35 = arith.addf %11, %34 : vector<8x32xf32>
    %c0_20 = arith.constant 0 : index
    %c0_21 = arith.constant 0 : index
    %36 = vector.load %arg6[%c0_20, %c0_21] : memref<1x32xf32, #tpu.memory_space<vmem>>, vector<1x32xf32>
    %cst_22 = arith.constant 1.000000e+00 : f32
    %37 = vector.broadcast %cst_22 : f32 to vector<1x32xf32>
    %38 = arith.subf %37, %36 : vector<1x32xf32>
    %39 = vector.broadcast %38 : vector<1x32xf32> to vector<8x32xf32>
    %40 = arith.mulf %39, %23 : vector<8x32xf32>
    %41 = arith.addf %11, %40 : vector<8x32xf32>
    %c0_23 = arith.constant 0 : index
    %c0_24 = arith.constant 0 : index
    %42 = vector.load %arg7[%c0_23, %c0_24] : memref<32x32xf32, #tpu.memory_space<vmem>>, vector<32x32xf32>
    %cst_25 = arith.constant dense<0.000000e+00> : vector<8x32xf32>
    %43 = tpu.matmul %29, %42, %cst_25 {dimension_numbers = #tpu.dot_dimension_numbers<[1], [0], [0], [1], [0, 0, 1, 1], [], []>} : vector<8x32xf32>, vector<32x32xf32>, vector<8x32xf32> -> vector<8x32xf32>
    %44 = arith.negf %43 : vector<8x32xf32>
    %45 = math.exp %44 : vector<8x32xf32>
    %cst_26 = arith.constant 1.000000e+00 : f32
    %46 = vector.broadcast %cst_26 : f32 to vector<8x32xf32>
    %47 = arith.addf %46, %45 : vector<8x32xf32>
    %48 = arith.divf %46, %47 : vector<8x32xf32>
    %c0_27 = arith.constant 0 : index
    %c0_28 = arith.constant 0 : index
    %49 = vector.load %arg8[%c0_27, %c0_28] : memref<32x32xf32, #tpu.memory_space<vmem>>, vector<32x32xf32>
    %cst_29 = arith.constant dense<0.000000e+00> : vector<8x32xf32>
    %50 = tpu.matmul %35, %49, %cst_29 {dimension_numbers = #tpu.dot_dimension_numbers<[1], [0], [0], [1], [0, 0, 1, 1], [], []>} : vector<8x32xf32>, vector<32x32xf32>, vector<8x32xf32> -> vector<8x32xf32>
    %51 = math.exp %50 : vector<8x32xf32>
    %c0_30 = arith.constant 0 : index
    %c0_31 = arith.constant 0 : index
    %52 = vector.load %arg9[%c0_30, %c0_31] : memref<32x32xf32, #tpu.memory_space<vmem>>, vector<32x32xf32>
    %cst_32 = arith.constant dense<0.000000e+00> : vector<8x32xf32>
    %53 = tpu.matmul %41, %52, %cst_32 {dimension_numbers = #tpu.dot_dimension_numbers<[1], [0], [0], [1], [0, 0, 1, 1], [], []>} : vector<8x32xf32>, vector<32x32xf32>, vector<8x32xf32> -> vector<8x32xf32>
    %c0_33 = arith.constant 0 : index
    %c0_34 = arith.constant 0 : index
    %54 = vector.load %arg11[%c0_33, %c0_34] : memref<1x32xf32, #tpu.memory_space<vmem>>, vector<1x32xf32>
    %55 = math.exp %54 : vector<1x32xf32>
    %56 = arith.mulf %51, %53 : vector<8x32xf32>
    %57 = vector.shape_cast %4 : vector<1x1x32xf32> to vector<1x1x32xf32>
    %58 = vector.broadcast %57 : vector<1x1x32xf32> to vector<1x8x32xf32>
    %59 = vector.shape_cast %58 : vector<1x8x32xf32> to vector<8x32xf32>
    %60 = vector.broadcast %55 : vector<1x32xf32> to vector<8x32xf32>
    %61 = arith.mulf %60, %59 : vector<8x32xf32>
    %cst_35 = arith.constant 0.000000e+00 : f32
    %62 = vector.shape_cast %15 : vector<8x1xi1> to vector<8x1xi1>
    %63 = vector.broadcast %62 : vector<8x1xi1> to vector<8x32xi1>
    %64 = vector.broadcast %cst_35 : f32 to vector<8x32xf32>
    %65 = arith.select %63, %61, %64 : vector<8x32xi1>, vector<8x32xf32>
    %66 = arith.addf %56, %65 : vector<8x32xf32>
    %c1_i32_36 = arith.constant 1 : i32
    %67 = tpu.dynamic_rotate %66 by %c1_i32_36 dim 0 : vector<8x32xf32>, i32 -> vector<8x32xf32>
    %c1_i32_37 = arith.constant 1 : i32
    %68 = vector.broadcast %c1_i32_37 : i32 to vector<8x1xi32>
    %69 = arith.cmpi sge, %13, %68 : vector<8x1xi32>
    %70 = vector.broadcast %55 : vector<1x32xf32> to vector<8x32xf32>
    %71 = arith.mulf %70, %67 : vector<8x32xf32>
    %cst_38 = arith.constant 0.000000e+00 : f32
    %72 = vector.shape_cast %69 : vector<8x1xi1> to vector<8x1xi1>
    %73 = vector.broadcast %72 : vector<8x1xi1> to vector<8x32xi1>
    %74 = vector.broadcast %cst_38 : f32 to vector<8x32xf32>
    %75 = arith.select %73, %71, %74 : vector<8x32xi1>, vector<8x32xf32>
    %76 = arith.addf %66, %75 : vector<8x32xf32>
    %77 = arith.mulf %55, %55 : vector<1x32xf32>
    %c2_i32 = arith.constant 2 : i32
    %78 = tpu.dynamic_rotate %76 by %c2_i32 dim 0 : vector<8x32xf32>, i32 -> vector<8x32xf32>
    %c2_i32_39 = arith.constant 2 : i32
    %79 = vector.broadcast %c2_i32_39 : i32 to vector<8x1xi32>
    %80 = arith.cmpi sge, %13, %79 : vector<8x1xi32>
    %81 = vector.broadcast %77 : vector<1x32xf32> to vector<8x32xf32>
    %82 = arith.mulf %81, %78 : vector<8x32xf32>
    %cst_40 = arith.constant 0.000000e+00 : f32
    %83 = vector.shape_cast %80 : vector<8x1xi1> to vector<8x1xi1>
    %84 = vector.broadcast %83 : vector<8x1xi1> to vector<8x32xi1>
    %85 = vector.broadcast %cst_40 : f32 to vector<8x32xf32>
    %86 = arith.select %84, %82, %85 : vector<8x32xi1>, vector<8x32xf32>
    %87 = arith.addf %76, %86 : vector<8x32xf32>
    %88 = arith.mulf %77, %77 : vector<1x32xf32>
    %c4_i32 = arith.constant 4 : i32
    %89 = tpu.dynamic_rotate %87 by %c4_i32 dim 0 : vector<8x32xf32>, i32 -> vector<8x32xf32>
    %c4_i32_41 = arith.constant 4 : i32
    %90 = vector.broadcast %c4_i32_41 : i32 to vector<8x1xi32>
    %91 = arith.cmpi sge, %13, %90 : vector<8x1xi32>
    %92 = vector.broadcast %88 : vector<1x32xf32> to vector<8x32xf32>
    %93 = arith.mulf %92, %89 : vector<8x32xf32>
    %cst_42 = arith.constant 0.000000e+00 : f32
    %94 = vector.shape_cast %91 : vector<8x1xi1> to vector<8x1xi1>
    %95 = vector.broadcast %94 : vector<8x1xi1> to vector<8x32xi1>
    %96 = vector.broadcast %cst_42 : f32 to vector<8x32xf32>
    %97 = arith.select %95, %93, %96 : vector<8x32xi1>, vector<8x32xf32>
    %98 = arith.addf %87, %97 : vector<8x32xf32>
    %99 = vector.shape_cast %98 : vector<8x32xf32> to vector<1x8x32xf32>
    %100 = vector.extract_strided_slice %99 {offsets = [0, 7, 0], sizes = [1, 1, 32], strides = [1, 1, 1]} : vector<1x8x32xf32> to vector<1x1x32xf32>
    %c0_43 = arith.constant 0 : index
    %c0_44 = arith.constant 0 : index
    %c0_45 = arith.constant 0 : index
    %101 = vector.load %arg14[%c0_43, %c0_44, %c0_45] : memref<1x1x32xf32, #tpu.memory_space<vmem>>, vector<1x1x32xf32>
    tpu.vector_store %arg14[%c0_43, %c0_44, %c0_45], %100 {strides = array<i32>} : memref<1x1x32xf32, #tpu.memory_space<vmem>>, vector<1x1x32xf32>,
    %102 = arith.mulf %48, %98 : vector<8x32xf32>
    %c0_46 = arith.constant 0 : index
    %c0_47 = arith.constant 0 : index
    %103 = vector.load %arg10[%c0_46, %c0_47] : memref<32x32xf32, #tpu.memory_space<vmem>>, vector<32x32xf32>
    %cst_48 = arith.constant dense<0.000000e+00> : vector<8x32xf32>
    %104 = tpu.matmul %102, %103, %cst_48 {dimension_numbers = #tpu.dot_dimension_numbers<[1], [0], [0], [1], [0, 0, 1, 1], [], []>} : vector<8x32xf32>, vector<32x32xf32>, vector<8x32xf32> -> vector<8x32xf32>
    %105 = vector.shape_cast %104 : vector<8x32xf32> to vector<1x8x32xf32>
    %c0_49 = arith.constant 0 : index
    %c0_50 = arith.constant 0 : index
    %c0_51 = arith.constant 0 : index
    %106 = vector.load %arg12[%c0_49, %c0_50, %c0_51] : memref<1x8x32xf32, #tpu.memory_space<vmem>>, vector<1x8x32xf32>
    tpu.vector_store %arg12[%c0_49, %c0_50, %c0_51], %105 {strides = array<i32>} : memref<1x8x32xf32, #tpu.memory_space<vmem>>, vector<1x8x32xf32>,
    return
  }
  func.func @transform_0(%arg0: i32, %arg1: i32) -> (i32, i32, i32) {
    %c0_i32 = arith.constant 0 : i32
    %c0_i32_0 = arith.constant 0 : i32
    return %arg0, %arg1, %c0_i32 : i32, i32, i32
  }
  func.func @transform_1(%arg0: i32, %arg1: i32) -> (i32, i32, i32) {
    %c0_i32 = arith.constant 0 : i32
    %c0_i32_0 = arith.constant 0 : i32
    %c0_i32_1 = arith.constant 0 : i32
    return %arg0, %c0_i32, %c0_i32_0 : i32, i32, i32
  }
  func.func @transform_2(%arg0: i32, %arg1: i32) -> (i32, i32) {
    %c0_i32 = arith.constant 0 : i32
    %c0_i32_0 = arith.constant 0 : i32
    %c0_i32_1 = arith.constant 0 : i32
    return %c0_i32, %c0_i32_0 : i32, i32
  }
  func.func @transform_3(%arg0: i32, %arg1: i32) -> (i32, i32) {
    %c0_i32 = arith.constant 0 : i32
    %c0_i32_0 = arith.constant 0 : i32
    %c0_i32_1 = arith.constant 0 : i32
    return %c0_i32, %c0_i32_0 : i32, i32
  }
  func.func @transform_4(%arg0: i32, %arg1: i32) -> (i32, i32) {
    %c0_i32 = arith.constant 0 : i32
    %c0_i32_0 = arith.constant 0 : i32
    %c0_i32_1 = arith.constant 0 : i32
    return %c0_i32, %c0_i32_0 : i32, i32
  }
  func.func @transform_5(%arg0: i32, %arg1: i32) -> (i32, i32) {
    %c0_i32 = arith.constant 0 : i32
    %c0_i32_0 = arith.constant 0 : i32
    %c0_i32_1 = arith.constant 0 : i32
    return %c0_i32, %c0_i32_0 : i32, i32
  }
  func.func @transform_6(%arg0: i32, %arg1: i32) -> (i32, i32) {
    %c0_i32 = arith.constant 0 : i32
    %c0_i32_0 = arith.constant 0 : i32
    %c0_i32_1 = arith.constant 0 : i32
    return %c0_i32, %c0_i32_0 : i32, i32
  }
  func.func @transform_7(%arg0: i32, %arg1: i32) -> (i32, i32) {
    %c0_i32 = arith.constant 0 : i32
    %c0_i32_0 = arith.constant 0 : i32
    %c0_i32_1 = arith.constant 0 : i32
    return %c0_i32, %c0_i32_0 : i32, i32
  }
  func.func @transform_8(%arg0: i32, %arg1: i32) -> (i32, i32) {
    %c0_i32 = arith.constant 0 : i32
    %c0_i32_0 = arith.constant 0 : i32
    %c0_i32_1 = arith.constant 0 : i32
    return %c0_i32, %c0_i32_0 : i32, i32
  }
  func.func @transform_9(%arg0: i32, %arg1: i32) -> (i32, i32) {
    %c0_i32 = arith.constant 0 : i32
    %c0_i32_0 = arith.constant 0 : i32
    %c0_i32_1 = arith.constant 0 : i32
    return %c0_i32, %c0_i32_0 : i32, i32
  }
  func.func @transform_10(%arg0: i32, %arg1: i32) -> (i32, i32, i32) {
    %c0_i32 = arith.constant 0 : i32
    %c0_i32_0 = arith.constant 0 : i32
    return %arg0, %arg1, %c0_i32 : i32, i32, i32
  }
  func.func @transform_11(%arg0: i32, %arg1: i32) -> (i32, i32, i32) {
    %c0_i32 = arith.constant 0 : i32
    %c0_i32_0 = arith.constant 0 : i32
    %c0_i32_1 = arith.constant 0 : i32
    return %arg0, %c0_i32, %c0_i32_0 : i32, i32, i32
  }
}

module attributes {stable_mosaic.version = 11 : i64} {
  func.func @_rwkv_kernel(%arg0: i32, %arg1: i32, %arg2: memref<1x8x32xf32, #tpu.memory_space<vmem>>, %arg3: memref<1x1x32xf32, #tpu.memory_space<vmem>>, %arg4: memref<1x32xf32, #tpu.memory_space<vmem>>, %arg5: memref<1x32xf32, #tpu.memory_space<vmem>>, %arg6: memref<1x32xf32, #tpu.memory_space<vmem>>, %arg7: memref<32x32xf32, #tpu.memory_space<vmem>>, %arg8: memref<32x32xf32, #tpu.memory_space<vmem>>, %arg9: memref<32x32xf32, #tpu.memory_space<vmem>>, %arg10: memref<32x32xf32, #tpu.memory_space<vmem>>, %arg11: memref<1x32xf32, #tpu.memory_space<vmem>>, %arg12: memref<1x8x32xf32, #tpu.memory_space<vmem>>, %arg13: memref<1x1x32xf32, #tpu.memory_space<vmem>>, %arg14: memref<1x1x32xf32, #tpu.memory_space<vmem>>, %arg15: memref<1x1x32xf32, #tpu.memory_space<vmem>>) attributes {dimension_semantics = [#tpu.dimension_semantics<parallel>, #tpu.dimension_semantics<arbitrary>], iteration_bounds = array<i64: 2, 1>, scalar_prefetch = 0 : i64, scratch_operands = 2 : i64, tpu.core_type = #tpu.core_type<tc>, window_params = [{transform_indices = @transform_0, window_bounds = array<i64: 1, 8, 32>}, {transform_indices = @transform_1, window_bounds = array<i64: 1, 1, 32>}, {pipeline_mode = #tpu.pipeline_mode<synchronous>, transform_indices = @transform_2, window_bounds = array<i64: 1, 32>}, {pipeline_mode = #tpu.pipeline_mode<synchronous>, transform_indices = @transform_3, window_bounds = array<i64: 1, 32>}, {pipeline_mode = #tpu.pipeline_mode<synchronous>, transform_indices = @transform_4, window_bounds = array<i64: 1, 32>}, {pipeline_mode = #tpu.pipeline_mode<synchronous>, transform_indices = @transform_5, window_bounds = array<i64: 32, 32>}, {pipeline_mode = #tpu.pipeline_mode<synchronous>, transform_indices = @transform_6, window_bounds = array<i64: 32, 32>}, {pipeline_mode = #tpu.pipeline_mode<synchronous>, transform_indices = @transform_7, window_bounds = array<i64: 32, 32>}, {pipeline_mode = #tpu.pipeline_mode<synchronous>, transform_indices = @transform_8, window_bounds = array<i64: 32, 32>}, {pipeline_mode = #tpu.pipeline_mode<synchronous>, transform_indices = @transform_9, window_bounds = array<i64: 1, 32>}, {transform_indices = @transform_10, window_bounds = array<i64: 1, 8, 32>}, {transform_indices = @transform_11, window_bounds = array<i64: 1, 1, 32>}]} {
    %c0_i32 = arith.constant 0 : i32
    %0 = arith.cmpi eq, %arg1, %c0_i32 : i32
    %1 = arith.extui %0 : i1 to i32
    %c0_i32_0 = arith.constant 0 : i32
    %2 = arith.cmpi ne, %1, %c0_i32_0 : i32
    scf.if %2 {
      %c0_52 = arith.constant 0 : index
      %c0_53 = arith.constant 0 : index
      %c0_54 = arith.constant 0 : index
      %107 = vector.load %arg3[%c0_52, %c0_53, %c0_54] : memref<1x1x32xf32, #tpu.memory_space<vmem>>, vector<1x1x32xf32>
      %c0_55 = arith.constant 0 : index
      %c0_56 = arith.constant 0 : index
      %c0_57 = arith.constant 0 : index
      %108 = vector.load %arg14[%c0_55, %c0_56, %c0_57] : memref<1x1x32xf32, #tpu.memory_space<vmem>>, vector<1x1x32xf32>
      tpu.vector_store %arg14[%c0_55, %c0_56, %c0_57], %107 {strides = array<i32>} : memref<1x1x32xf32, #tpu.memory_space<vmem>>, vector<1x1x32xf32>,
      %c0_58 = arith.constant 0 : index
      %c0_59 = arith.constant 0 : index
      %c0_60 = arith.constant 0 : index
      %109 = vector.load %arg15[%c0_58, %c0_59, %c0_60] : memref<1x1x32xf32, #tpu.memory_space<vmem>>, vector<1x1x32xf32>
      tpu.vector_store %arg15[%c0_58, %c0_59, %c0_60], %107 {strides = array<i32>} : memref<1x1x32xf32, #tpu.memory_space<vmem>>, vector<1x1x32xf32>,
    } else {
    }
    %c0 = arith.constant 0 : index
    %c0_1 = arith.constant 0 : index
    %c0_2 = arith.constant 0 : index
    %3 = vector.load %arg15[%c0, %c0_1, %c0_2] : memref<1x1x32xf32, #tpu.memory_space<vmem>>, vector<1x1x32xf32>
    %c0_3 = arith.constant 0 : index
    %c0_4 = arith.constant 0 : index
    %c0_5 = arith.constant 0 : index
    %4 = vector.load %arg14[%c0_3, %c0_4, %c0_5] : memref<1x1x32xf32, #tpu.memory_space<vmem>>, vector<1x1x32xf32>
    %c0_6 = arith.constant 0 : index
    %c0_7 = arith.constant 0 : index
    %c0_8 = arith.constant 0 : index
    %5 = vector.load %arg2[%c0_6, %c0_7, %c0_8] : memref<1x8x32xf32, #tpu.memory_space<vmem>>, vector<1x8x32xf32>
    %6 = vector.extract_strided_slice %5 {offsets = [0, 7, 0], sizes = [1, 1, 32], strides = [1, 1, 1]} : vector<1x8x32xf32> to vector<1x1x32xf32>
    %c0_9 = arith.constant 0 : index
    %c0_10 = arith.constant 0 : index
    %c0_11 = arith.constant 0 : index
    %7 = vector.load %arg15[%c0_9, %c0_10, %c0_11] : memref<1x1x32xf32, #tpu.memory_space<vmem>>, vector<1x1x32xf32>
    tpu.vector_store %arg15[%c0_9, %c0_10, %c0_11], %6 {strides = array<i32>} : memref<1x1x32xf32, #tpu.memory_space<vmem>>, vector<1x1x32xf32>,
    %c0_i32_12 = arith.constant 0 : i32
    %8 = arith.cmpi eq, %arg1, %c0_i32_12 : i32
    %9 = arith.extui %8 : i1 to i32
    %c0_i32_13 = arith.constant 0 : i32
    %10 = arith.cmpi ne, %9, %c0_i32_13 : i32
    scf.if %10 {
      %c0_52 = arith.constant 0 : index
      %c0_53 = arith.constant 0 : index
      %c0_54 = arith.constant 0 : index
      %107 = vector.load %arg13[%c0_52, %c0_53, %c0_54] : memref<1x1x32xf32, #tpu.memory_space<vmem>>, vector<1x1x32xf32>
      tpu.vector_store %arg13[%c0_52, %c0_53, %c0_54], %6 {strides = array<i32>} : memref<1x1x32xf32, #tpu.memory_space<vmem>>, vector<1x1x32xf32>,
    } else {
    }
    %11 = vector.shape_cast %5 : vector<1x8x32xf32> to vector<8x32xf32>
    %12 = tpu.iota {dimensions = array<i32: 1>} : vector<1x8x1xi32>
    %13 = vector.shape_cast %12 : vector<1x8x1xi32> to vector<8x1xi32>
    %c0_i32_14 = arith.constant 0 : i32
    %14 = vector.broadcast %c0_i32_14 : i32 to vector<8x1xi32>
    %15 = arith.cmpi eq, %13, %14 : vector<8x1xi32>
    %c1_i32 = arith.constant 1 : i32
    %16 = tpu.dynamic_rotate %11 by %c1_i32 dim 0 : vector<8x32xf32>, i32 -> vector<8x32xf32>
    %17 = vector.shape_cast %3 : vector<1x1x32xf32> to vector<1x1x32xf32>
    %18 = vector.broadcast %17 : vector<1x1x32xf32> to vector<1x8x32xf32>
    %19 = vector.shape_cast %18 : vector<1x8x32xf32> to vector<8x32xf32>
    %20 = vector.shape_cast %15 : vector<8x1xi1> to vector<8x1xi1>
    %21 = vector.broadcast %20 : vector<8x1xi1> to vector<8x32xi1>
    %22 = arith.select %21, %19, %16 : vector<8x32xi1>, vector<8x32xf32>
    %23 = arith.subf %22, %11 : vector<8x32xf32>
    %c0_15 = arith.constant 0 : index
    %c0_16 = arith.constant 0 : index
    %24 = vector.load %arg4[%c0_15, %c0_16] : memref<1x32xf32, #tpu.memory_space<vmem>>, vector<1x32xf32>
    %cst = arith.constant 1.000000e+00 : f32
    %25 = vector.broadcast %cst : f32 to vector<1x32xf32>
    %26 = arith.subf %25, %24 : vector<1x32xf32>
    %27 = vector.broadcast %26 : vector<1x32xf32> to vector<8x32xf32>
    %28 = arith.mulf %27, %23 : vector<8x32xf32>
    %29 = arith.addf %11, %28 : vector<8x32xf32>
    %c0_17 = arith.constant 0 : index
    %c0_18 = arith.constant 0 : index
    %30 = vector.load %arg5[%c0_17, %c0_18] : memref<1x32xf32, #tpu.memory_space<vmem>>, vector<1x32xf32>
    %cst_19 = arith.constant 1.000000e+00 : f32
    %31 = vector.broadcast %cst_19 : f32 to vector<1x32xf32>
    %32 = arith.subf %31, %30 : vector<1x32xf32>
    %33 = vector.broadcast %32 : vector<1x32xf32> to vector<8x32xf32>
    %34 = arith.mulf %33, %23 : vector<8x32xf32>
    %35 = arith.addf %11, %34 : vector<8x32xf32>
    %c0_20 = arith.constant 0 : index
    %c0_21 = arith.constant 0 : index
    %36 = vector.load %arg6[%c0_20, %c0_21] : memref<1x32xf32, #tpu.memory_space<vmem>>, vector<1x32xf32>
    %cst_22 = arith.constant 1.000000e+00 : f32
    %37 = vector.broadcast %cst_22 : f32 to vector<1x32xf32>
    %38 = arith.subf %37, %36 : vector<1x32xf32>
    %39 = vector.broadcast %38 : vector<1x32xf32> to vector<8x32xf32>
    %40 = arith.mulf %39, %23 : vector<8x32xf32>
    %41 = arith.addf %11, %40 : vector<8x32xf32>
    %c0_23 = arith.constant 0 : index
    %c0_24 = arith.constant 0 : index
    %42 = vector.load %arg7[%c0_23, %c0_24] : memref<32x32xf32, #tpu.memory_space<vmem>>, vector<32x32xf32>
    %cst_25 = arith.constant dense<0.000000e+00> : vector<8x32xf32>
    %43 = tpu.matmul %29, %42, %cst_25 {dimension_numbers = #tpu.dot_dimension_numbers<[1], [0], [0], [1], [0, 0, 1, 1], [], []>} : vector<8x32xf32>, vector<32x32xf32>, vector<8x32xf32> -> vector<8x32xf32>
    %44 = arith.negf %43 : vector<8x32xf32>
    %45 = math.exp %44 : vector<8x32xf32>
    %cst_26 = arith.constant 1.000000e+00 : f32
    %46 = vector.broadcast %cst_26 : f32 to vector<8x32xf32>
    %47 = arith.addf %46, %45 : vector<8x32xf32>
    %48 = arith.divf %46, %47 : vector<8x32xf32>
    %c0_27 = arith.constant 0 : index
    %c0_28 = arith.constant 0 : index
    %49 = vector.load %arg8[%c0_27, %c0_28] : memref<32x32xf32, #tpu.memory_space<vmem>>, vector<32x32xf32>
    %cst_29 = arith.constant dense<0.000000e+00> : vector<8x32xf32>
    %50 = tpu.matmul %35, %49, %cst_29 {dimension_numbers = #tpu.dot_dimension_numbers<[1], [0], [0], [1], [0, 0, 1, 1], [], []>} : vector<8x32xf32>, vector<32x32xf32>, vector<8x32xf32> -> vector<8x32xf32>
    %51 = math.exp %50 : vector<8x32xf32>
    %c0_30 = arith.constant 0 : index
    %c0_31 = arith.constant 0 : index
    %52 = vector.load %arg9[%c0_30, %c0_31] : memref<32x32xf32, #tpu.memory_space<vmem>>, vector<32x32xf32>
    %cst_32 = arith.constant dense<0.000000e+00> : vector<8x32xf32>
    %53 = tpu.matmul %41, %52, %cst_32 {dimension_numbers = #tpu.dot_dimension_numbers<[1], [0], [0], [1], [0, 0, 1, 1], [], []>} : vector<8x32xf32>, vector<32x32xf32>, vector<8x32xf32> -> vector<8x32xf32>
    %c0_33 = arith.constant 0 : index
    %c0_34 = arith.constant 0 : index
    %54 = vector.load %arg11[%c0_33, %c0_34] : memref<1x32xf32, #tpu.memory_space<vmem>>, vector<1x32xf32>
    %55 = math.exp %54 : vector<1x32xf32>
    %56 = arith.mulf %51, %53 : vector<8x32xf32>
    %57 = vector.shape_cast %4 : vector<1x1x32xf32> to vector<1x1x32xf32>
    %58 = vector.broadcast %57 : vector<1x1x32xf32> to vector<1x8x32xf32>
    %59 = vector.shape_cast %58 : vector<1x8x32xf32> to vector<8x32xf32>
    %60 = vector.broadcast %55 : vector<1x32xf32> to vector<8x32xf32>
    %61 = arith.mulf %60, %59 : vector<8x32xf32>
    %cst_35 = arith.constant 0.000000e+00 : f32
    %62 = vector.shape_cast %15 : vector<8x1xi1> to vector<8x1xi1>
    %63 = vector.broadcast %62 : vector<8x1xi1> to vector<8x32xi1>
    %64 = vector.broadcast %cst_35 : f32 to vector<8x32xf32>
    %65 = arith.select %63, %61, %64 : vector<8x32xi1>, vector<8x32xf32>
    %66 = arith.addf %56, %65 : vector<8x32xf32>
    %c1_i32_36 = arith.constant 1 : i32
    %67 = tpu.dynamic_rotate %66 by %c1_i32_36 dim 0 : vector<8x32xf32>, i32 -> vector<8x32xf32>
    %c1_i32_37 = arith.constant 1 : i32
    %68 = vector.broadcast %c1_i32_37 : i32 to vector<8x1xi32>
    %69 = arith.cmpi sge, %13, %68 : vector<8x1xi32>
    %70 = vector.broadcast %55 : vector<1x32xf32> to vector<8x32xf32>
    %71 = arith.mulf %70, %67 : vector<8x32xf32>
    %cst_38 = arith.constant 0.000000e+00 : f32
    %72 = vector.shape_cast %69 : vector<8x1xi1> to vector<8x1xi1>
    %73 = vector.broadcast %72 : vector<8x1xi1> to vector<8x32xi1>
    %74 = vector.broadcast %cst_38 : f32 to vector<8x32xf32>
    %75 = arith.select %73, %71, %74 : vector<8x32xi1>, vector<8x32xf32>
    %76 = arith.addf %66, %75 : vector<8x32xf32>
    %77 = arith.mulf %55, %55 : vector<1x32xf32>
    %c2_i32 = arith.constant 2 : i32
    %78 = tpu.dynamic_rotate %76 by %c2_i32 dim 0 : vector<8x32xf32>, i32 -> vector<8x32xf32>
    %c2_i32_39 = arith.constant 2 : i32
    %79 = vector.broadcast %c2_i32_39 : i32 to vector<8x1xi32>
    %80 = arith.cmpi sge, %13, %79 : vector<8x1xi32>
    %81 = vector.broadcast %77 : vector<1x32xf32> to vector<8x32xf32>
    %82 = arith.mulf %81, %78 : vector<8x32xf32>
    %cst_40 = arith.constant 0.000000e+00 : f32
    %83 = vector.shape_cast %80 : vector<8x1xi1> to vector<8x1xi1>
    %84 = vector.broadcast %83 : vector<8x1xi1> to vector<8x32xi1>
    %85 = vector.broadcast %cst_40 : f32 to vector<8x32xf32>
    %86 = arith.select %84, %82, %85 : vector<8x32xi1>, vector<8x32xf32>
    %87 = arith.addf %76, %86 : vector<8x32xf32>
    %88 = arith.mulf %77, %77 : vector<1x32xf32>
    %c4_i32 = arith.constant 4 : i32
    %89 = tpu.dynamic_rotate %87 by %c4_i32 dim 0 : vector<8x32xf32>, i32 -> vector<8x32xf32>
    %c4_i32_41 = arith.constant 4 : i32
    %90 = vector.broadcast %c4_i32_41 : i32 to vector<8x1xi32>
    %91 = arith.cmpi sge, %13, %90 : vector<8x1xi32>
    %92 = vector.broadcast %88 : vector<1x32xf32> to vector<8x32xf32>
    %93 = arith.mulf %92, %89 : vector<8x32xf32>
    %cst_42 = arith.constant 0.000000e+00 : f32
    %94 = vector.shape_cast %91 : vector<8x1xi1> to vector<8x1xi1>
    %95 = vector.broadcast %94 : vector<8x1xi1> to vector<8x32xi1>
    %96 = vector.broadcast %cst_42 : f32 to vector<8x32xf32>
    %97 = arith.select %95, %93, %96 : vector<8x32xi1>, vector<8x32xf32>
    %98 = arith.addf %87, %97 : vector<8x32xf32>
    %99 = vector.shape_cast %98 : vector<8x32xf32> to vector<1x8x32xf32>
    %100 = vector.extract_strided_slice %99 {offsets = [0, 7, 0], sizes = [1, 1, 32], strides = [1, 1, 1]} : vector<1x8x32xf32> to vector<1x1x32xf32>
    %c0_43 = arith.constant 0 : index
    %c0_44 = arith.constant 0 : index
    %c0_45 = arith.constant 0 : index
    %101 = vector.load %arg14[%c0_43, %c0_44, %c0_45] : memref<1x1x32xf32, #tpu.memory_space<vmem>>, vector<1x1x32xf32>
    tpu.vector_store %arg14[%c0_43, %c0_44, %c0_45], %100 {strides = array<i32>} : memref<1x1x32xf32, #tpu.memory_space<vmem>>, vector<1x1x32xf32>,
    %102 = arith.mulf %48, %98 : vector<8x32xf32>
    %c0_46 = arith.constant 0 : index
    %c0_47 = arith.constant 0 : index
    %103 = vector.load %arg10[%c0_46, %c0_47] : memref<32x32xf32, #tpu.memory_space<vmem>>, vector<32x32xf32>
    %cst_48 = arith.constant dense<0.000000e+00> : vector<8x32xf32>
    %104 = tpu.matmul %102, %103, %cst_48 {dimension_numbers = #tpu.dot_dimension_numbers<[1], [0], [0], [1], [0, 0, 1, 1], [], []>} : vector<8x32xf32>, vector<32x32xf32>, vector<8x32xf32> -> vector<8x32xf32>
    %105 = vector.shape_cast %104 : vector<8x32xf32> to vector<1x8x32xf32>
    %c0_49 = arith.constant 0 : index
    %c0_50 = arith.constant 0 : index
    %c0_51 = arith.constant 0 : index
    %106 = vector.load %arg12[%c0_49, %c0_50, %c0_51] : memref<1x8x32xf32, #tpu.memory_space<vmem>>, vector<1x8x32xf32>
    tpu.vector_store %arg12[%c0_49, %c0_50, %c0_51], %105 {strides = array<i32>} : memref<1x8x32xf32, #tpu.memory_space<vmem>>, vector<1x8x32xf32>,
    return
  }
  func.func @transform_0(%arg0: i32, %arg1: i32) -> (i32, i32, i32) {
    %c0_i32 = arith.constant 0 : i32
    %c0_i32_0 = arith.constant 0 : i32
    return %arg0, %arg1, %c0_i32 : i32, i32, i32
  }
  func.func @transform_1(%arg0: i32, %arg1: i32) -> (i32, i32, i32) {
    %c0_i32 = arith.constant 0 : i32
    %c0_i32_0 = arith.constant 0 : i32
    %c0_i32_1 = arith.constant 0 : i32
    return %arg0, %c0_i32, %c0_i32_0 : i32, i32, i32
  }
  func.func @transform_2(%arg0: i32, %arg1: i32) -> (i32, i32) {
    %c0_i32 = arith.constant 0 : i32
    %c0_i32_0 = arith.constant 0 : i32
    %c0_i32_1 = arith.constant 0 : i32
    return %c0_i32, %c0_i32_0 : i32, i32
  }
  func.func @transform_3(%arg0: i32, %arg1: i32) -> (i32, i32) {
    %c0_i32 = arith.constant 0 : i32
    %c0_i32_0 = arith.constant 0 : i32
    %c0_i32_1 = arith.constant 0 : i32
    return %c0_i32, %c0_i32_0 : i32, i32
  }
  func.func @transform_4(%arg0: i32, %arg1: i32) -> (i32, i32) {
    %c0_i32 = arith.constant 0 : i32
    %c0_i32_0 = arith.constant 0 : i32
    %c0_i32_1 = arith.constant 0 : i32
    return %c0_i32, %c0_i32_0 : i32, i32
  }
  func.func @transform_5(%arg0: i32, %arg1: i32) -> (i32, i32) {
    %c0_i32 = arith.constant 0 : i32
    %c0_i32_0 = arith.constant 0 : i32
    %c0_i32_1 = arith.constant 0 : i32
    return %c0_i32, %c0_i32_0 : i32, i32
  }
  func.func @transform_6(%arg0: i32, %arg1: i32) -> (i32, i32) {
    %c0_i32 = arith.constant 0 : i32
    %c0_i32_0 = arith.constant 0 : i32
    %c0_i32_1 = arith.constant 0 : i32
    return %c0_i32, %c0_i32_0 : i32, i32
  }
  func.func @transform_7(%arg0: i32, %arg1: i32) -> (i32, i32) {
    %c0_i32 = arith.constant 0 : i32
    %c0_i32_0 = arith.constant 0 : i32
    %c0_i32_1 = arith.constant 0 : i32
    return %c0_i32, %c0_i32_0 : i32, i32
  }
  func.func @transform_8(%arg0: i32, %arg1: i32) -> (i32, i32) {
    %c0_i32 = arith.constant 0 : i32
    %c0_i32_0 = arith.constant 0 : i32
    %c0_i32_1 = arith.constant 0 : i32
    return %c0_i32, %c0_i32_0 : i32, i32
  }
  func.func @transform_9(%arg0: i32, %arg1: i32) -> (i32, i32) {
    %c0_i32 = arith.constant 0 : i32
    %c0_i32_0 = arith.constant 0 : i32
    %c0_i32_1 = arith.constant 0 : i32
    return %c0_i32, %c0_i32_0 : i32, i32
  }
  func.func @transform_10(%arg0: i32, %arg1: i32) -> (i32, i32, i32) {
    %c0_i32 = arith.constant 0 : i32
    %c0_i32_0 = arith.constant 0 : i32
    return %arg0, %arg1, %c0_i32 : i32, i32, i32
  }
  func.func @transform_11(%arg0: i32, %arg1: i32) -> (i32, i32, i32) {
    %c0_i32 = arith.constant 0 : i32
    %c0_i32_0 = arith.constant 0 : i32
    %c0_i32_1 = arith.constant 0 : i32
    return %arg0, %c0_i32, %c0_i32_0 : i32, i32, i32
  }
}

</mosaic_0001>

<bundles_post_ra>
// kernel: tpu_custom_call.1
= control target key start
LH: loop header
LB: loop body
LE: loop exit
PB: predicated region body
PF: predicated region fallthrough
CT: control target
= control target key end

     0   :  { %s2107_s0 = inlined_call_operand.hbm [shape: f32[2,8,32], index: 0, kind: input, shape index: {}]   ;;  %s2108_s1 = inlined_call_operand.vmem [shape: f32[2,1,32], index: 1, kind: input, shape index: {}]   ;;  %s2109_s2 = inlined_call_operand.vmem [shape: f32[1,32], index: 2, kind: input, shape index: {}]   ;;  %s2110_s3 = inlined_call_operand.vmem [shape: f32[1,32], index: 3, kind: input, shape index: {}]   ;;  %s2111_s4 = inlined_call_operand.vmem [shape: f32[1,32], index: 4, kind: input, shape index: {}]   ;;  %s2112_s5 = inlined_call_operand.hbm [shape: f32[32,32], index: 5, kind: input, shape index: {}]   ;;  %s2113_s6 = inlined_call_operand.hbm [shape: f32[32,32], index: 6, kind: input, shape index: {}]   ;;  %s2114_s7 = inlined_call_operand.hbm [shape: f32[32,32], index: 7, kind: input, shape index: {}]   ;;  %s2115_s8 = inlined_call_operand.hbm [shape: f32[32,32], index: 8, kind: input, shape index: {}]   ;;  %s2116_s9 = inlined_call_operand.vmem [shape: f32[1,32], index: 9, kind: input, shape index: {}]   ;;  %s2117_s10 = inlined_call_operand.hbm [shape: f32[2,8,32], index: 10, kind: output, shape index: {0}]   ;;  %s2118_s11 = inlined_call_operand.hbm [shape: f32[2,1,32], index: 11, kind: output, shape index: {1}]  }
   0x1   :  { %2126 = sst [smem:[#allocation21_spill]] %s2109_s2 }
   0x2   :  { %2127 = sst [smem:[#allocation22_spill]] %s2111_s4 }
   0x3   :  { %2128 = sst [smem:[#allocation23_spill]] %s2112_s5 }
   0x4   :  { %2129 = sst [smem:[#allocation24_spill]] %s2116_s9 }
   0x5   :  { %2130 = sst [smem:[#allocation25_spill]] %s2117_s10 }
   0x6   :  { %2131 = sst [smem:[#allocation26_spill]] %s2118_s11 }
   0x7   :  { %17 = vsyncpa [#allocation5], 0 }
   0x8   :  { %19 = vsyncpa [#allocation5 + $0x1], 0 }
   0x9   :  { %20 = vsyncpa [#allocation8], 0 }
   0xa   :  { %21 = vsyncpa [#allocation11], 0 }
   0xb   :  { %22 = vsyncpa [#allocation6], 0 }
   0xc   :  { %24 = vsyncpa [#allocation6 + $0x1], 0 }
   0xd   :  { %25 = vsyncpa [#allocation15], 0 }
   0xe   :  { %27 = vsyncpa [#allocation15 + $0x1], 0  ;;  %s1699_s17 = smov 0   ;;  %s1701_s18 = smov 0  }
   0xf   :  { %s1703_s19 = smov 0   ;;  %s1705_s20 = smov 0  }
  0x10   :  { %s1707_s21 = smov 0   ;;  %s1709_s22 = smov 0  }
  0x11 LB: > { %s2119_s23 = sadd.s32 4294967295, %s1625_s22   ;;  %p1125_p0 = scmp.ge.s32.totalorder %s1625_s22, 1  ;;  %s1625_s22 = sphi %s1709_s22, %s33_s22   ;;  %s1621_s21 = sphi %s1707_s21, %s2158_s21   ;;  %s1617_s20 = sphi %s1705_s20, %s2157_s20   ;;  %s1613_s19 = sphi %s1703_s19, %s2156_s19   ;;  %s1609_s18 = sphi %s1701_s18, %s2155_s18   ;;  %s1605_s17 = sphi %s1699_s17, %s2154_s17  }
  0x12   : > { %p1733_p1 = scmp.eq.s32.totalorder %s2119_s23, 0  ;;  %p326_p2 = scmp.lt.s32.totalorder %s1625_s22, 3 }
  0x13   : > { %s1627_s26 = smov [#allocation7]   ;;  %s1628_s29 = smov [#allocation10]  }
  0x14   : > { %s2132_s24 = scalar_select %p1733_p1, 1, 0 }
  0x15   : > { %p1738_p3 = pnand %p1125_p0, %p326_p2  ;;  %s347_s27 = sshll.u32 %s1627_s26, 4  ;;  %s1742_s27 = int_to_ptr.vmem [resolvable:$true] %s347_s27 }
  0x16   : > { %s373_s30 = sshll.u32 %s1628_s29, 4  ;;  %s1629_s12 = smov [#allocation9]   ;;  %s1753_s30 = int_to_ptr.vmem [resolvable:$true] %s373_s30 }
  0x17   : > { %s2133_s25 = scalar_select %p1738_p3, 1, 0 }
  0x18   : > { %p1262_p4 = pneg %p1738_p3  ;;  %s1755_s13 = sshll.u32 %s1629_s12, 4  ;;  %s361_s13 = int_to_ptr.vmem [resolvable:$true] %s1755_s13 }
  0x19   : > { %s2135_s5 = sld [smem:[#allocation23_spill]] }
  0x1a   : > { %p1749_p6 = pnand %p1262_p4, %p1733_p1 }
  0x1c   : > { %p1765_p8 = pneg %p1749_p6 }
  0x1f   : > { %s1361_s16 = scalar_lea.hbm %s2135_s5, 512 }
  0x20   : > { %p1362_p7 = scmp.ne.s32.totalorder %s2135_s5, %s1361_s16  ;;  %p1368_p11 = scmp.lt.u32.totalorder %s1361_s16, %s2135_s5 }
  0x22   : > { %p1364_p9 = pnand %p1765_p8, %p1362_p7 }
  0x24   : > { %p1365_p10 = pneg %p1364_p9 }
  0x26   : > { %p1370_p12 = pnand %p1368_p11, %p1365_p10 }
  0x28   : > { %1373 = shalt.err (!%p1370_p12)
}
  0x29   : > { %s1374_s23 = scalar_lea.vmem %s1742_s27, 512  ;;  %p1382_p4 = scmp.lt.s32.totalorder %s1742_s27, %s1742_s27 }
  0x2a   : > { %p1375_p13 = scmp.ne.s32.totalorder %s1742_s27, %s1374_s23  ;;  %p1383_p5 = scmp.lt.s32.totalorder %s1374_s23, %s1374_s23 }
  0x2c   : > { %p1377_p0 = pnand %p1375_p13, %p1765_p8  ;;  %p1384_p7 = por %p1383_p5, %p1382_p4 }
  0x2e   : > { %p1378_p2 = pneg %p1377_p0 }
  0x30   : > { %p1385_p9 = pnand %p1384_p7, %p1378_p2 }
  0x32   : > { %1388 = shalt.err (!%p1385_p9)
}
  0x33   : > { %s1630_s14 = smov 128   ;;  %s1631_s15 = smov 8  }
  0x34   : > { %1265 = dma.hbm_to_vmem [thread:$0]  (!%p1749_p6), %s2135_s5, 512, %s1742_s27, [#allocation8], %s1630_s14, %s1630_s14, %s1631_s15  }
  0x35   : > { %s1389_s23 = scalar_lea.hbm %s2114_s7, 512 }
  0x36   : > { %p1390_p5 = scmp.ne.s32.totalorder %s2114_s7, %s1389_s23  ;;  %p1396_p12 = scmp.lt.u32.totalorder %s1389_s23, %s2114_s7 }
  0x38   : > { %p1392_p10 = pnand %p1390_p5, %p1765_p8 }
  0x3a   : > { %p1393_p11 = pneg %p1392_p10 }
  0x3c   : > { %p1398_p13 = pnand %p1396_p12, %p1393_p11 }
  0x3e   : > { %1401 = shalt.err (!%p1398_p13)
}
  0x3f   : > { %s1402_s27 = scalar_lea.vmem %s1753_s30, 512  ;;  %p1410_p7 = scmp.lt.s32.totalorder %s1753_s30, %s1753_s30 }
  0x40   : > { %p1403_p0 = scmp.ne.s32.totalorder %s1753_s30, %s1402_s27  ;;  %p1411_p9 = scmp.lt.s32.totalorder %s1402_s27, %s1402_s27 }
  0x42   : > { %p1405_p2 = pnand %p1403_p0, %p1765_p8  ;;  %p1412_p5 = por %p1411_p9, %p1410_p7 }
  0x44   : > { %p1406_p4 = pneg %p1405_p2 }
  0x46   : > { %p1413_p10 = pnand %p1412_p5, %p1406_p4 }
  0x48   : > { %1416 = shalt.err (!%p1413_p10)
}
  0x49   : > { %1271 = dma.hbm_to_vmem [thread:$0]  (!%p1749_p6), %s2114_s7, 512, %s1753_s30, [#allocation11], %s1630_s14, %s1630_s14, %s1631_s15  }
  0x4a   : > { %s1417_s16 = scalar_lea.hbm %s2113_s6, 512 }
  0x4b   : > { %p1418_p11 = scmp.ne.s32.totalorder %s2113_s6, %s1417_s16  ;;  %p1424_p0 = scmp.lt.u32.totalorder %s1417_s16, %s2113_s6 }
  0x4d   : > { %p1420_p12 = pnand %p1418_p11, %p1765_p8 }
  0x4f   : > { %p1421_p13 = pneg %p1420_p12 }
  0x51   : > { %p1426_p2 = pnand %p1424_p0, %p1421_p13 }
  0x53   : > { %1429 = shalt.err (!%p1426_p2)
}
  0x54   : > { %s1430_s27 = scalar_lea.vmem %s361_s13, 512  ;;  %p1438_p5 = scmp.lt.s32.totalorder %s361_s13, %s361_s13 }
  0x55   : > { %p1431_p4 = scmp.ne.s32.totalorder %s361_s13, %s1430_s27  ;;  %p1439_p10 = scmp.lt.s32.totalorder %s1430_s27, %s1430_s27 }
  0x57   : > { %p1433_p7 = pnand %p1431_p4, %p1765_p8  ;;  %p1440_p3 = por %p1439_p10, %p1438_p5 }
  0x59   : > { %p1434_p9 = pneg %p1433_p7 }
  0x5b   : > { %p1441_p1 = pnand %p1440_p3, %p1434_p9 }
  0x5d   : > { %1444 = shalt.err (!%p1441_p1)
}
  0x5e   : > { %1268 = dma.hbm_to_vmem [thread:$0]  (!%p1749_p6), %s2113_s6, 512, %s361_s13, [#allocation8], %s1630_s14, %s1630_s14, %s1631_s15  }
  0x5f   : > { %s1632_s4 = smov [#allocation12]   ;;  %s1445_s26 = scalar_lea.hbm %s2115_s8, 512 }
  0x60   : > { %s386_s9 = sshll.u32 %s1632_s4, 4  ;;  %p1446_p1 = scmp.ne.s32.totalorder %s2115_s8, %s1445_s26  ;;  %s387_s9 = int_to_ptr.vmem [resolvable:$true] %s386_s9 }
  0x61   : > { %p1452_p12 = scmp.lt.u32.totalorder %s1445_s26, %s2115_s8 }
  0x62   : > { %p1448_p3 = pnand %p1446_p1, %p1765_p8 }
  0x64   : > { %p1449_p11 = pneg %p1448_p3 }
  0x66   : > { %p1454_p13 = pnand %p1452_p12, %p1449_p11 }
  0x68   : > { %1457 = shalt.err (!%p1454_p13)
}
  0x69   : > { %s1458_s13 = scalar_lea.vmem %s387_s9, 512  ;;  %p1466_p7 = scmp.lt.s32.totalorder %s387_s9, %s387_s9 }
  0x6a   : > { %p1459_p0 = scmp.ne.s32.totalorder %s387_s9, %s1458_s13  ;;  %p1467_p9 = scmp.lt.s32.totalorder %s1458_s13, %s1458_s13 }
  0x6c   : > { %p1461_p2 = pnand %p1459_p0, %p1765_p8  ;;  %p1468_p5 = por %p1467_p9, %p1466_p7 }
  0x6e   : > { %p1462_p4 = pneg %p1461_p2 }
  0x70   : > { %p1469_p10 = pnand %p1468_p5, %p1462_p4 }
  0x72   : > { %1472 = shalt.err (!%p1469_p10)
}
  0x73   : > { %1274 = dma.hbm_to_vmem [thread:$0]  (!%p1749_p6), %s2115_s8, 512, %s387_s9, [#allocation11], %s1630_s14, %s1630_s14, %s1631_s15  }
  0x74   : > { %s1124_s10 = sadd.s32 4294967294, %s1625_s22   ;;  %s45_s28 = sadd.s32 1, %s1621_s21 }
  0x75   : > { %p47_p8 = scmp.ge.s32.totalorder %s45_s28, 2  ;;  %s54_s4 = sadd.s32 1, %s1613_s19 }
  0x76   : > { %p61_p1 = scmp.ne.s32.totalorder %s1613_s19, %s1609_s18  ;;  %p62_p3 = scmp.eq.s32.totalorder %s1625_s22, 0 }
  0x77   : > { %s2160_s28 = smov (%p47_p8, %s45_s28), 0  ;;  %p67_p12 = scmp.ne.s32.totalorder %s1609_s18, %s1605_s17 }
  0x78   : > { %p1866_p11 = por %p62_p3, %p61_p1  ;;  %s49_s14 = ssub.s32 %s1621_s21, %s2160_s28 }
  0x79   : > { %s2138_s15 = sadd.s32 4294967295, %s1625_s22   ;;  %p52_p13 = scmp.eq.s32.totalorder %s49_s14, 0 }
  0x7a   : > { %p287_p6 = scmp.eq.s32.totalorder %s2138_s15, 1  ;;  %p2139_p0 = scmp.ne.s32.totalorder %s2132_s24, 0 }
  0x7b   : > { %p293_p7 = scmp.eq.s32.totalorder %s1124_s10, 1  ;;  %p1290_p5 = scmp.lt.s32.totalorder %s1625_s22, 2 }
  0x7c   : > { %p1878_p2 = por %p2139_p0, %p67_p12  ;;  %p1882_p4 = por %p287_p6, %p61_p1 }
  0x7d   : > { %s1887_s26 = scalar_select %p52_p13, %s1613_s19, %s54_s4  }
  0x7e   : > { %s2141_s16 = scalar_select %p1882_p4, 1, 0 }
  0x7f   : > { %p1889_p9 = por %p293_p7, %p67_p12  ;;  %s403_s12 = sand.u32 1, %s1613_s19  }
  0x80   : > { %s1132_s23 = sshll.u32 %s1621_s21, 7  ;;  %s1131_s27 = sshll.u32 %s403_s12, 3 }
  0x81   : > { %s2142_s29 = scalar_select %p1889_p9, 1, 0 }
  0x82   : > { %s1899_s2 = scalar_lea.hbm %s2107_s0, %s1132_s23  ;;  %s407_s10 = scalar_lea.vmem [#allocation4], %s1131_s27 }
  0x83   : > { %s415_s4 = sshll.u32 %s407_s10, 4  ;;  %p1903_p10 = pnand %p1290_p5, %p1866_p11  ;;  %s1907_s4 = int_to_ptr.vmem [resolvable:$true] %s415_s4 }
  0x84   : > { %s404_s15 = scalar_lea.sflag [#allocation5], %s403_s12  ;;  %s1473_s5 = scalar_lea.hbm %s1899_s2, 128 }
  0x85   : > { %p1474_p8 = scmp.ne.s32.totalorder %s1899_s2, %s1473_s5  ;;  %p1475_p1 = pneg %p1903_p10 }
  0x86   : > { %s1478_s11 = scalar_lea.hbm %s2107_s0, 256  ;;  %p1479_p11 = scmp.lt.u32.totalorder %s1899_s2, %s2107_s0 }
  0x87   : > { %p1476_p3 = pnand %p1475_p1, %p1474_p8  ;;  %p1480_p6 = scmp.lt.u32.totalorder %s1478_s11, %s1473_s5 }
  0x88   : > { %p1482_p0 = scmp.lt.u32.totalorder %s1473_s5, %s1899_s2 }
  0x89   : > { %p1477_p12 = pneg %p1476_p3  ;;  %p1481_p13 = por %p1480_p6, %p1479_p11 }
  0x8b   : > { %p1483_p7 = por %p1482_p0, %p1481_p13 }
  0x8d   : > { %p1484_p5 = pnand %p1483_p7, %p1477_p12 }
  0x8f   : > { %1487 = shalt.err (!%p1484_p5)
}
  0x90   : > { %s1488_s12 = scalar_lea.vmem %s1907_s4, 128  ;;  %s1633_s10 = smov [#allocation4]  }
  0x91   : > { %p1489_p8 = scmp.ne.s32.totalorder %s1907_s4, %s1488_s12  ;;  %s1493_s23 = sshll.u32 %s1633_s10, 4  ;;  %s1494_s23 = int_to_ptr.vmem [resolvable:$false] %s1493_s23 }
  0x92   : > { %s1495_s27 = scalar_lea.vmem %s1494_s23, 256  ;;  %p1496_p4 = scmp.lt.s32.totalorder %s1907_s4, %s1494_s23 }
  0x93   : > { %p1491_p3 = pnand %p1489_p8, %p1475_p1  ;;  %p1497_p11 = scmp.lt.s32.totalorder %s1495_s27, %s1488_s12 }
  0x95   : > { %p1492_p9 = pneg %p1491_p3  ;;  %p1498_p6 = por %p1497_p11, %p1496_p4 }
  0x97   : > { %p1499_p13 = pnand %p1498_p6, %p1492_p9 }
  0x99   : > { %1502 = shalt.err (!%p1499_p13)
}
  0x9a   : > { %1278 = dma.hbm_to_vmem [thread:$0]  (!%p1903_p10), %s1899_s2, 128, %s1907_s4, %s404_s15  }
  0x9b   : > { %p2144_p12 = scmp.ne.s32.totalorder %s2133_s25, 0 }
  0x9c   : > { %s1937_s5 = sand.u32 (!%p2144_p12), 1, %s1609_s18  }
  0x9d   : > { %430 = sbr.rel (%p2144_p12) target bundleno = 669 (0x29d), region = 60  ;;  %s1134_s11 = sshll.u32 (!%p2144_p12), %s1937_s5, 3 }
  0x9e   : > { %s433_s13 = scalar_lea.sflag (!%p2144_p12), [#allocation5], %s1937_s5  ;;  %s1943_s30 = scalar_lea.vmem (!%p2144_p12), [#allocation4], %s1134_s11 }
  0xa4   : > { %1584 = dma.done.wait (%p1878_p2), %s433_s13, 128  }
  0xa5   : > { %1586 = vsyncadd (%p1878_p2), %s433_s13, 4294967168  ;;  %p2145_p4 = scmp.ne.s32.totalorder %s2132_s24, 0 }
  0xa7   : > { %1588 = dma.done.wait (%p2145_p4), [#allocation8], 1024  }
  0xa8   : > { %1590 = vsyncadd (%p2145_p4), [#allocation8], 4294966272 }
  0xa9   : > { %1592 = dma.done.wait (%p2145_p4), [#allocation11], 1024  }
  0xaa   : > { %1594 = vsyncadd (%p2145_p4), [#allocation11], 4294966272  ;;  %p498_p9 = scmp.lt.s32.totalorder %s1617_s20, 1  ;;  %v1634_v0 = vmov 0.0|0.0   ;;  %vm1635_vm0 = vmmov 0   ;;  %v1636_v1 = vmov 0.0   ;;  %v518_v2 = vlaneseq }
  0xab   : > { %1222 = vmatprep.subr.bf16.mxu1 %v1634_v0  ;;  %1216 = vmatprep.subr.bf16.mxu0 %v1634_v0  ;;  %v646_v3 = vld [vmem:[#allocation9] sm:$0xff]  ;;  %v647_v4 = vld [vmem:[#allocation9 + $0x8] sm:$0xff]  ;;  %vm506_vm1 = vcmask 253952   ;;  %v648_v8 = vld [vmem:[#allocation9 + $0x10] sm:$0xff]  ;;  %s2146_s10 = sld [smem:[#allocation21_spill]]  ;;  %s2147_s13 = sld [smem:[#allocation22_spill]] }
  0xac   : > { %1191 = vmatprep.mubr.msk.f32.mxu1 %vm1635_vm0, %v1636_v1  ;;  %s499_s25 = scalar_select %p498_p9, %s1617_s20, 1  ;;  %1180 = vmatprep.mubr.msk.f32.mxu0 %vm1635_vm0, %v1636_v1  ;;  %v562_v5 = vld [vmem:[#allocation7] sm:$0xff]  ;;  %v1223_v6 = vpack.c.bf16 %v647_v4, %v646_v3  ;;  %v563_v7 = vld [vmem:[#allocation7 + $0x8] sm:$0xff]  ;;  %v649_v9 = vld [vmem:[#allocation9 + $0x18] sm:$0xff]  ;;  %v1968_v12 = vshrl.u32 %v518_v2, 7  ;;  %vm566_vm3 = vcmask 261120  }
  0xad   : > { %v1217_v10 = vpack.c.bf16 %v563_v7, %v562_v5  ;;  %v542_v13 = vld [vmem:[%s2110_s3] sm:$0x1]  ;;  %v1226_v14 = vpack.c.bf16 %v649_v9, %v648_v8  ;;  %v564_v15 = vld [vmem:[#allocation7 + $0x10] sm:$0xff]  ;;  %v565_v16 = vld [vmem:[#allocation7 + $0x18] sm:$0xff]  ;;  %vm512_vm4 = vcmask 261127   ;;  %s2148_s24 = sld [smem:[#allocation24_spill]] }
  0xae   : > { %s500_s2 = scalar_lea.vmem %s2108_s1, %s499_s25  ;;  %1224 = vmatpush3.bf16.msra.mxu1 %v1223_v6  ;;  %v1978_v18 = vld [vmem:[%s1943_s30] sm:$0xff]  ;;  %v1220_v19 = vpack.c.bf16 %v565_v16, %v564_v15  ;;  %v1982_v20 = vsub.s32 0, %v1968_v12  ;;  %v543_v21 = vsub.f32 1.0, %v542_v13  ;;  %vm520_vm2 = vcmp.eq.s32.totalorder %v1968_v12, 0  ;;  %v725_v31 = vld [vmem:[#allocation10] sm:$0xff]  ;;  %v726_v32 = vld [vmem:[#allocation10 + $0x8] sm:$0xff] }
  0xaf   : > { %v505_v11 = vld [vmem:[%s500_s2] sm:$0x1]  ;;  %1225 = vmatprep.subr.bf16.mxu1 %v1634_v0  ;;  %1218 = vmatpush3.bf16.msra.mxu0 %v1217_v10  ;;  %v521_v23 = vrot.slane %v1978_v18, 7  ;;  %v1229_v36 = vpack.c.bf16 %v726_v32, %v725_v31  ;;  %v727_v39 = vld [vmem:[#allocation10 + $0x10] sm:$0xff]  ;;  %v728_v40 = vld [vmem:[#allocation10 + $0x18] sm:$0xff]  ;;  %vm822_vm5 = vcmp.ge.s32.totalorder %v1968_v12, 1 }
  0xb0   : > { %508 = vst.msk [vmem:[#allocation3] sm:$0x1] %vm506_vm1, %v505_v11  ;;  %507 = vst.msk [vmem:[#allocation2] sm:$0x1] %vm506_vm1, %v505_v11  ;;  %1219 = vmatprep.subr.bf16.mxu0 %v1634_v0  ;;  %v548_v26 = vrot.slane %v543_v21, %v1982_v20  ;;  %v1232_v42 = vpack.c.bf16 %v728_v40, %v727_v39  ;;  %v858_v44 = vld [vmem:[#allocation12] sm:$0xff]  ;;  %v859_v45 = vld [vmem:[#allocation12 + $0x8] sm:$0xff] }
  0xb1   : > { %v532_v17 = vld [vmem:[%s2146_s10] sm:$0x1]  ;;  %v1235_v46 = vpack.c.bf16 %v859_v45, %v858_v44  ;;  %v860_v47 = vld [vmem:[#allocation12 + $0x10] sm:$0xff]  ;;  %v861_v48 = vld [vmem:[#allocation12 + $0x18] sm:$0xff]  ;;  %vm830_vm6 = vcmp.ge.s32.totalorder %v1968_v12, 2  ;;  %vm844_vm7 = vcmp.ge.s32.totalorder %v1968_v12, 4 }
  0xb2   : > { %v533_v22 = vsub.f32 1.0, %v532_v17  ;;  %1227 = vmatpush3.bf16.msra.mxu1 %v1226_v14  ;;  %v552_v24 = vld [vmem:[%s2147_s13] sm:$0x1]  ;;  %v1238_v49 = vpack.c.bf16 %v861_v48, %v860_v47  ;;  %s497_s9 = scalar_lea.vmem [#allocation14], %s1937_s5  ;;  %s1149_s2 = sshll.u32 %s1617_s20, 4 }
  0xb3   : > { %1221 = vmatpush3.bf16.msra.mxu0 %v1220_v19  ;;  %1234 = vmatprep.subr.bf16.mxu1 %v1634_v0  ;;  %v553_v28 = vsub.f32 1.0, %v552_v24  ;;  %v802_v50 = vld [vmem:[%s2148_s24] sm:$0x1]  ;;  %517 = vst.msk [vmem:[%s497_s9 - $0x7] sm:$0x80] %vm512_vm4, %v1978_v18  ;;  %s968_s4 = sshll.u32 %s497_s9, 4  ;;  %s969_s4 = int_to_ptr.vmem [resolvable:$true] %s968_s4 }
  0xb4   : > { %1228 = vmatprep.subr.bf16.mxu0 %v1634_v0  ;;  %v538_v27 = vrot.slane %v533_v22, %v1982_v20  ;;  %v803_v51 = vmul.f32 1.442695, %v802_v50  ;;  %s2149_s12 = sld [smem:[#allocation26_spill]]  ;;  %s942_s23 = scalar_lea.sflag [#allocation15], %s1937_s5 }
  0xb5   : > { %v558_v35 = vrot.slane %v553_v28, %v1982_v20  ;;  %s1503_s27 = scalar_lea.vmem %s969_s4, 16  ;;  %p2150_p10 = scmp.ne.s32.totalorder %s2141_s16, 0 }
  0xb6   : > { %1353 = vpow2.f32 %v803_v51  ;;  %p1504_p2 = scmp.ne.s32.totalorder %s969_s4, %s1503_s27  ;;  %s1637_s13 = smov [#allocation14]  }
  0xb7   : > { %v1140_v25 = vld [vmem:[#allocation3] ss:$0 sm:$0xff]  ;;  %v1145_v59 = vld [vmem:[#allocation2] ss:$0 sm:$0xff]  ;;  %s1507_s30 = sshll.u32 %s1637_s13, 4  ;;  %s1508_s30 = int_to_ptr.vmem [resolvable:$false] %s1507_s30 }
  0xb8   : > { %v530_v29 = vsel %vm520_vm2, %v1140_v25, %v521_v23  ;;  %513 = vst.msk [vmem:[#allocation3 - $0x7] sm:$0x80] %vm512_vm4, %v1978_v18  ;;  %p1505_p1 = pnand %p1504_p2, %p2150_p10  ;;  %s1509_s25 = scalar_lea.vmem %s1508_s30, 32 }
  0xb9   : > { %v531_v30 = vsub.f32 %v530_v29, %v1978_v18  ;;  %p1510_p7 = scmp.lt.s32.totalorder %s969_s4, %s1508_s30  ;;  %p1511_p5 = scmp.lt.s32.totalorder %s1509_s25, %s1503_s27 }
  0xba   : > { %s2031_s10 = scalar_lea.hbm %s2149_s12, %s1149_s2  ;;  %p1506_p0 = pneg %p1505_p1 }
  0xbb   : > { %v550_v33 = vmul.f32 %v548_v26, %v531_v30  ;;  %v540_v34 = vmul.f32 %v538_v27, %v531_v30  ;;  %v560_v41 = vmul.f32 %v558_v35, %v531_v30  ;;  %p1512_p8 = por %p1511_p5, %p1510_p7 }
  0xbd   : > { %v551_v37 = vadd.f32 %v550_v33, %v1978_v18  ;;  %v541_v38 = vadd.f32 %v540_v34, %v1978_v18  ;;  %v561_v43 = vadd.f32 %v560_v41, %v1978_v18  ;;  %p1513_p3 = pnand %p1512_p8, %p1506_p0 }
  0xbf   : > { %1192 = vmatmul.mubr.msk.f32.vlgmr.msra.gmra.mrb[0].mxu1 %vm566_vm3, %v551_v37  ;;  %1181 = vmatmul.mubr.msk.f32.vlgmr.msra.gmra.mrb[0].mxu0 %vm566_vm3, %v541_v38 }
  0xc0   : > { %1230 = vmatpush3.bf16.msra.mxu0 %v1229_v36  ;;  %1202 = vmatprep.mubr.msk.f32.mxu0 %vm1635_vm0, %v1636_v1  ;;  %v1354_v57 = vpop.eup %1353 }
  0xc1   : > { %1231 = vmatprep.subr.bf16.mxu0 %v1634_v0  ;;  %1213 = vmatprep.mubr.msk.f32.mxu1 %vm1635_vm0, %v1636_v1  ;;  %v816_v58 = vrot.slane %v1354_v57, %v1982_v20  ;;  %v828_v5 = vmul.f32 %v1354_v57, %v1354_v57 }
  0xc2   : > { %1236 = vmatpush3.bf16.msra.mxu1 %v1235_v46 }
  0xc3   : > { %1237 = vmatprep.subr.bf16.mxu1 %v1634_v0  ;;  %v818_v62 = vmul.f32 %v1145_v59, %v816_v58  ;;  %v835_v10 = vrot.slane %v828_v5, %v1982_v20  ;;  %v842_v14 = vmul.f32 %v828_v5, %v828_v5 }
  0xc4   : > { %1233 = vmatpush3.bf16.msra.mxu0 %v1232_v42 }
  0xc5   : > { %v819_v1 = vsel %vm520_vm2, %v818_v62, 0.0  ;;  %v849_v19 = vrot.slane %v842_v14, %v1982_v20 }
  0xc6   : > { %1239 = vmatpush3.bf16.msra.mxu1 %v1238_v49 }
  0xc7   : > { %1203 = vmatmul.mubr.msk.f32.vlgmr.msra.gmra.mrb[2].mxu0 %vm566_vm3, %v561_v43 }
 0x192   : > { %v719_v52 = vpop.f32.mrb[0].mxu1  ;;  %v636_v53 = vpop.f32.mrb[0].mxu0 }
 0x193   : > { %v723_v54 = vmul.f32 1.442695, %v719_v52  ;;  %v1193_v55 = vpop.f32.mrb[1].mxu1  ;;  %v1182_v56 = vpop.f32.mrb[1].mxu0  ;;  %v1142_v60 = vmul.f32 -1.442695, %v636_v53 }
 0x195   : > { %1355 = vpow2.f32 %v723_v54 }
 0x196   : > { %1357 = vpow2.f32 %v1142_v60 }
 0x19a   : > { %v798_v61 = vpop.f32.mrb[2].mxu0 }
 0x19b   : > { %v1204_v63 = vpop.f32.mrb[3].mxu0 }
 0x19f   : > { %v1356_v0 = vpop.eup %1355 }
 0x1a0   : > { %v805_v2 = vmul.f32 %v1356_v0, %v798_v61  ;;  %v1358_v7 = vpop.eup %1357 }
 0x1a1   : > { %v643_v11 = vadd.f32 1.0, %v1358_v7 }
 0x1a2   : > { %v820_v3 = vadd.f32 %v819_v1, %v805_v2 }
 0x1a3   : > { %1359 = vrcp.f32 %v643_v11 }
 0x1a4   : > { %v821_v4 = vrot.slane %v820_v3, 7 }
 0x1a6   : > { %v823_v6 = vmul.f32 %v821_v4, %v816_v58 }
 0x1a8   : > { %v826_v8 = vsel %vm822_vm5, %v823_v6, 0.0 }
 0x1a9   : > { %v827_v9 = vadd.f32 %v826_v8, %v820_v3 }
 0x1ab   : > { %v829_v13 = vrot.slane %v827_v9, 6 }
 0x1ad   : > { %v837_v15 = vmul.f32 %v835_v10, %v829_v13  ;;  %v1360_v25 = vpop.eup %1359 }
 0x1af   : > { %v840_v16 = vsel %vm830_vm6, %v837_v15, 0.0 }
 0x1b0   : > { %v841_v17 = vadd.f32 %v840_v16, %v827_v9 }
 0x1b2   : > { %v843_v21 = vrot.slane %v841_v17, 4 }
 0x1b4   : > { %v851_v22 = vmul.f32 %v849_v19, %v843_v21 }
 0x1b6   : > { %v854_v23 = vsel %vm844_vm7, %v851_v22, 0.0 }
 0x1b7   : > { %v855_v24 = vadd.f32 %v854_v23, %v841_v17 }
 0x1b9   : > { %v857_v26 = vmul.f32 %v1360_v25, %v855_v24  ;;  %856 = vst.msk [vmem:[#allocation2 - $0x7] sm:$0x80] %vm512_vm4, %v855_v24 }
 0x1bb   : > { %1214 = vmatmul.mubr.msk.f32.vlgmr.msra.gmra.mrb[2].mxu1 %vm566_vm3, %v857_v26 }
 0x1bc   : > { %1516 = shalt.err (!%p1513_p3)
}
 0x1bd   : > { %s1517_s24 = scalar_lea.hbm %s2031_s10, 16  ;;  %s1521_s14 = scalar_lea.hbm %s2149_s12, 32 }
 0x1be   : > { %p1518_p11 = scmp.ne.s32.totalorder %s2031_s10, %s1517_s24  ;;  %p1522_p12 = scmp.lt.u32.totalorder %s2031_s10, %s2149_s12 }
 0x1bf   : > { %p1523_p4 = scmp.lt.u32.totalorder %s1521_s14, %s1517_s24  ;;  %p1525_p2 = scmp.lt.u32.totalorder %s1517_s24, %s2031_s10 }
 0x1c0   : > { %p1519_p6 = pnand %p1518_p11, %p2150_p10 }
 0x1c1   : > { %p1524_p9 = por %p1523_p4, %p1522_p12 }
 0x1c2   : > { %p1520_p13 = pneg %p1519_p6 }
 0x1c3   : > { %p1526_p1 = por %p1525_p2, %p1524_p9 }
 0x1c5   : > { %p1527_p0 = pnand %p1526_p1, %p1520_p13 }
 0x1c7   : > { %1530 = shalt.err (!%p1527_p0)
}
 0x1c8   : > { %1259 = dma.vmem_to_hbm [thread:$0]  (%p2150_p10), %s969_s4, 16, %s2031_s10, %s942_s23  }
 0x1c9   : > { %s1148_s27 = sshll.u32 %s1617_s20, 7  ;;  %s491_s30 = scalar_lea.vmem [#allocation13], %s1134_s11 }
 0x1ca   : > { %s955_s25 = sshll.u32 %s491_s30, 4  ;;  %s2151_s14 = sld [smem:[#allocation25_spill]]  ;;  %s2059_s25 = int_to_ptr.vmem [resolvable:$true] %s955_s25 }
 0x1cb   : > { %s937_s24 = scalar_lea.sflag [#allocation6], %s1937_s5  ;;  %s1531_s4 = scalar_lea.vmem %s2059_s25, 128 }
 0x1cc   : > { %p1532_p7 = scmp.ne.s32.totalorder %s2059_s25, %s1531_s4  ;;  %s1638_s20 = smov [#allocation13]  }
 0x1cd   : > { %s1535_s11 = sshll.u32 %s1638_s20, 4  ;;  %s1536_s11 = int_to_ptr.vmem [resolvable:$false] %s1535_s11 }
 0x1ce   : > { %p1533_p5 = pnand %p1532_p7, %p2150_p10  ;;  %s1537_s10 = scalar_lea.vmem %s1536_s11, 256 }
 0x1cf   : > { %p1538_p3 = scmp.lt.s32.totalorder %s2059_s25, %s1536_s11  ;;  %p1539_p11 = scmp.lt.s32.totalorder %s1537_s10, %s1531_s4 }
 0x1d0   : > { %s2057_s15 = scalar_lea.hbm %s2151_s14, %s1148_s27  ;;  %p1534_p8 = pneg %p1533_p5 }
 0x1d1   : > { %p1540_p6 = por %p1539_p11, %p1538_p3 }
 0x1d3   : > { %p1541_p13 = pnand %p1540_p6, %p1534_p8 }
 0x28e   : > { %v931_v12 = vpop.f32.mrb[2].mxu1 }
 0x28f   : > { %935 = vst.msk [vmem:[%s491_s30] sm:$0xff] %vm566_vm3, %v931_v12  ;;  %v1215_v18 = vpop.f32.mrb[3].mxu1 }
 0x290   : > { %1544 = shalt.err (!%p1541_p13)
}
 0x291   : > { %s1545_s5 = scalar_lea.hbm %s2057_s15, 128  ;;  %s1549_s27 = scalar_lea.hbm %s2151_s14, 256 }
 0x292   : > { %p1546_p12 = scmp.ne.s32.totalorder %s2057_s15, %s1545_s5  ;;  %p1550_p2 = scmp.lt.u32.totalorder %s2057_s15, %s2151_s14 }
 0x293   : > { %p1551_p1 = scmp.lt.u32.totalorder %s1549_s27, %s1545_s5  ;;  %p1553_p7 = scmp.lt.u32.totalorder %s1545_s5, %s2057_s15 }
 0x294   : > { %p1547_p4 = pnand %p1546_p12, %p2150_p10 }
 0x295   : > { %p1552_p0 = por %p1551_p1, %p1550_p2 }
 0x296   : > { %p1548_p9 = pneg %p1547_p4 }
 0x297   : > { %p1554_p5 = por %p1553_p7, %p1552_p0 }
 0x299   : > { %p1555_p8 = pnand %p1554_p5, %p1548_p9 }
 0x29b   : > { %1558 = shalt.err (!%p1555_p8)
}
 0x29c   : > { %1258 = dma.vmem_to_hbm [thread:$0]  (%p2150_p10), %s2059_s25, 128, %s2057_s15, %s937_s24  }
 0x29d PF: > { %s980_s2 = sand.u32 1, %s1605_s17   ;;  %p2152_p3 = scmp.ne.s32.totalorder %s2142_s29, 0 }
 0x29e   : > { %p2153_p11 = scmp.ge.s32.totalorder %s1625_s22, 2  ;;  %s981_s4 = scalar_lea.sflag [#allocation6], %s980_s2 }
 0x2a0   : > { %p1280_p6 = pnand %p2153_p11, %p2152_p3 }
 0x2a2   : > { %1596 = dma.done.wait (!%p1280_p6), %s981_s4, 128  }
 0x2a3   : > { %1598 = vsyncadd (!%p1280_p6), %s981_s4, 4294967168  ;;  %s990_s20 = scalar_lea.sflag [#allocation15], %s980_s2 }
 0x2a4   : > { %1600 = dma.done.wait (!%p1280_p6), %s990_s20, 16  }
 0x2a5   : > { %1602 = vsyncadd (!%p1280_p6), %s990_s20, 4294967280  ;;  %s33_s22 = sadd.s32 1, %s1625_s22   ;;  %s2154_s17 = smov %s1609_s18 }
 0x2a6   : > { %p30_p13 = scmp.ge.s32.totalorder %s33_s22, 4   ;;  %s2155_s18 = smov %s1613_s19 }
 0x2a7   : > { %s2156_s19 = smov %s1887_s26  ;;  %s2157_s20 = smov %s1621_s21 }
 0x2a8   : > { %s2158_s21 = smov %s2160_s28  ;;  %32 = sbr.rel (!%p30_p13) target bundleno = 17 (0x11), region = 149 }
 0x2af   :  { %994 = vsyncpa [#allocation5], 1 }
 0x2b0   :  { %996 = vsyncpa [#allocation5 + $0x1], 1 }
 0x2b1   :  { %997 = vsyncpa [#allocation8], 1 }
 0x2b2   :  { %998 = vsyncpa [#allocation11], 1 }
 0x2b3   :  { %999 = vsyncpa [#allocation6], 1 }
 0x2b4   :  { %1001 = vsyncpa [#allocation6 + $0x1], 1 }
 0x2b5   :  { %1002 = vsyncpa [#allocation15], 1 }
 0x2b6   :  { %1004 = vsyncpa [#allocation15 + $0x1], 1 }

// kernel: tpu_custom_call.1
= control target key start
LH: loop header
LB: loop body
LE: loop exit
PB: predicated region body
PF: predicated region fallthrough
CT: control target
= control target key end

     0   :  { %s2107_s0 = inlined_call_operand.hbm [shape: f32[2,8,32], index: 0, kind: input, shape index: {}]   ;;  %s2108_s1 = inlined_call_operand.vmem [shape: f32[2,1,32], index: 1, kind: input, shape index: {}]   ;;  %s2109_s2 = inlined_call_operand.vmem [shape: f32[1,32], index: 2, kind: input, shape index: {}]   ;;  %s2110_s3 = inlined_call_operand.vmem [shape: f32[1,32], index: 3, kind: input, shape index: {}]   ;;  %s2111_s4 = inlined_call_operand.vmem [shape: f32[1,32], index: 4, kind: input, shape index: {}]   ;;  %s2112_s5 = inlined_call_operand.hbm [shape: f32[32,32], index: 5, kind: input, shape index: {}]   ;;  %s2113_s6 = inlined_call_operand.hbm [shape: f32[32,32], index: 6, kind: input, shape index: {}]   ;;  %s2114_s7 = inlined_call_operand.hbm [shape: f32[32,32], index: 7, kind: input, shape index: {}]   ;;  %s2115_s8 = inlined_call_operand.hbm [shape: f32[32,32], index: 8, kind: input, shape index: {}]   ;;  %s2116_s9 = inlined_call_operand.vmem [shape: f32[1,32], index: 9, kind: input, shape index: {}]   ;;  %s2117_s10 = inlined_call_operand.hbm [shape: f32[2,8,32], index: 10, kind: output, shape index: {0}]   ;;  %s2118_s11 = inlined_call_operand.hbm [shape: f32[2,1,32], index: 11, kind: output, shape index: {1}]  }
   0x1   :  { %2126 = sst [smem:[#allocation21_spill]] %s2109_s2 }
   0x2   :  { %2127 = sst [smem:[#allocation22_spill]] %s2111_s4 }
   0x3   :  { %2128 = sst [smem:[#allocation23_spill]] %s2112_s5 }
   0x4   :  { %2129 = sst [smem:[#allocation24_spill]] %s2116_s9 }
   0x5   :  { %2130 = sst [smem:[#allocation25_spill]] %s2117_s10 }
   0x6   :  { %2131 = sst [smem:[#allocation26_spill]] %s2118_s11 }
   0x7   :  { %17 = vsyncpa [#allocation5], 0 }
   0x8   :  { %19 = vsyncpa [#allocation5 + $0x1], 0 }
   0x9   :  { %20 = vsyncpa [#allocation8], 0 }
   0xa   :  { %21 = vsyncpa [#allocation11], 0 }
   0xb   :  { %22 = vsyncpa [#allocation6], 0 }
   0xc   :  { %24 = vsyncpa [#allocation6 + $0x1], 0 }
   0xd   :  { %25 = vsyncpa [#allocation15], 0 }
   0xe   :  { %27 = vsyncpa [#allocation15 + $0x1], 0  ;;  %s1699_s17 = smov 0   ;;  %s1701_s18 = smov 0  }
   0xf   :  { %s1703_s19 = smov 0   ;;  %s1705_s20 = smov 0  }
  0x10   :  { %s1707_s21 = smov 0   ;;  %s1709_s22 = smov 0  }
  0x11 LB: > { %s2119_s23 = sadd.s32 4294967295, %s1625_s22   ;;  %p1125_p0 = scmp.ge.s32.totalorder %s1625_s22, 1  ;;  %s1625_s22 = sphi %s1709_s22, %s33_s22   ;;  %s1621_s21 = sphi %s1707_s21, %s2158_s21   ;;  %s1617_s20 = sphi %s1705_s20, %s2157_s20   ;;  %s1613_s19 = sphi %s1703_s19, %s2156_s19   ;;  %s1609_s18 = sphi %s1701_s18, %s2155_s18   ;;  %s1605_s17 = sphi %s1699_s17, %s2154_s17  }
  0x12   : > { %p1733_p1 = scmp.eq.s32.totalorder %s2119_s23, 0  ;;  %p326_p2 = scmp.lt.s32.totalorder %s1625_s22, 3 }
  0x13   : > { %s1627_s26 = smov [#allocation7]   ;;  %s1628_s29 = smov [#allocation10]  }
  0x14   : > { %s2132_s24 = scalar_select %p1733_p1, 1, 0 }
  0x15   : > { %p1738_p3 = pnand %p1125_p0, %p326_p2  ;;  %s347_s27 = sshll.u32 %s1627_s26, 4  ;;  %s1742_s27 = int_to_ptr.vmem [resolvable:$true] %s347_s27 }
  0x16   : > { %s373_s30 = sshll.u32 %s1628_s29, 4  ;;  %s1629_s12 = smov [#allocation9]   ;;  %s1753_s30 = int_to_ptr.vmem [resolvable:$true] %s373_s30 }
  0x17   : > { %s2133_s25 = scalar_select %p1738_p3, 1, 0 }
  0x18   : > { %p1262_p4 = pneg %p1738_p3  ;;  %s1755_s13 = sshll.u32 %s1629_s12, 4  ;;  %s361_s13 = int_to_ptr.vmem [resolvable:$true] %s1755_s13 }
  0x19   : > { %s2135_s5 = sld [smem:[#allocation23_spill]] }
  0x1a   : > { %p1749_p6 = pnand %p1262_p4, %p1733_p1 }
  0x1c   : > { %p1765_p8 = pneg %p1749_p6 }
  0x1f   : > { %s1361_s16 = scalar_lea.hbm %s2135_s5, 512 }
  0x20   : > { %p1362_p7 = scmp.ne.s32.totalorder %s2135_s5, %s1361_s16  ;;  %p1368_p11 = scmp.lt.u32.totalorder %s1361_s16, %s2135_s5 }
  0x22   : > { %p1364_p9 = pnand %p1765_p8, %p1362_p7 }
  0x24   : > { %p1365_p10 = pneg %p1364_p9 }
  0x26   : > { %p1370_p12 = pnand %p1368_p11, %p1365_p10 }
  0x28   : > { %1373 = shalt.err (!%p1370_p12)
}
  0x29   : > { %s1374_s23 = scalar_lea.vmem %s1742_s27, 512  ;;  %p1382_p4 = scmp.lt.s32.totalorder %s1742_s27, %s1742_s27 }
  0x2a   : > { %p1375_p13 = scmp.ne.s32.totalorder %s1742_s27, %s1374_s23  ;;  %p1383_p5 = scmp.lt.s32.totalorder %s1374_s23, %s1374_s23 }
  0x2c   : > { %p1377_p0 = pnand %p1375_p13, %p1765_p8  ;;  %p1384_p7 = por %p1383_p5, %p1382_p4 }
  0x2e   : > { %p1378_p2 = pneg %p1377_p0 }
  0x30   : > { %p1385_p9 = pnand %p1384_p7, %p1378_p2 }
  0x32   : > { %1388 = shalt.err (!%p1385_p9)
}
  0x33   : > { %s1630_s14 = smov 128   ;;  %s1631_s15 = smov 8  }
  0x34   : > { %1265 = dma.hbm_to_vmem [thread:$0]  (!%p1749_p6), %s2135_s5, 512, %s1742_s27, [#allocation8], %s1630_s14, %s1630_s14, %s1631_s15  }
  0x35   : > { %s1389_s23 = scalar_lea.hbm %s2114_s7, 512 }
  0x36   : > { %p1390_p5 = scmp.ne.s32.totalorder %s2114_s7, %s1389_s23  ;;  %p1396_p12 = scmp.lt.u32.totalorder %s1389_s23, %s2114_s7 }
  0x38   : > { %p1392_p10 = pnand %p1390_p5, %p1765_p8 }
  0x3a   : > { %p1393_p11 = pneg %p1392_p10 }
  0x3c   : > { %p1398_p13 = pnand %p1396_p12, %p1393_p11 }
  0x3e   : > { %1401 = shalt.err (!%p1398_p13)
}
  0x3f   : > { %s1402_s27 = scalar_lea.vmem %s1753_s30, 512  ;;  %p1410_p7 = scmp.lt.s32.totalorder %s1753_s30, %s1753_s30 }
  0x40   : > { %p1403_p0 = scmp.ne.s32.totalorder %s1753_s30, %s1402_s27  ;;  %p1411_p9 = scmp.lt.s32.totalorder %s1402_s27, %s1402_s27 }
  0x42   : > { %p1405_p2 = pnand %p1403_p0, %p1765_p8  ;;  %p1412_p5 = por %p1411_p9, %p1410_p7 }
  0x44   : > { %p1406_p4 = pneg %p1405_p2 }
  0x46   : > { %p1413_p10 = pnand %p1412_p5, %p1406_p4 }
  0x48   : > { %1416 = shalt.err (!%p1413_p10)
}
  0x49   : > { %1271 = dma.hbm_to_vmem [thread:$0]  (!%p1749_p6), %s2114_s7, 512, %s1753_s30, [#allocation11], %s1630_s14, %s1630_s14, %s1631_s15  }
  0x4a   : > { %s1417_s16 = scalar_lea.hbm %s2113_s6, 512 }
  0x4b   : > { %p1418_p11 = scmp.ne.s32.totalorder %s2113_s6, %s1417_s16  ;;  %p1424_p0 = scmp.lt.u32.totalorder %s1417_s16, %s2113_s6 }
  0x4d   : > { %p1420_p12 = pnand %p1418_p11, %p1765_p8 }
  0x4f   : > { %p1421_p13 = pneg %p1420_p12 }
  0x51   : > { %p1426_p2 = pnand %p1424_p0, %p1421_p13 }
  0x53   : > { %1429 = shalt.err (!%p1426_p2)
}
  0x54   : > { %s1430_s27 = scalar_lea.vmem %s361_s13, 512  ;;  %p1438_p5 = scmp.lt.s32.totalorder %s361_s13, %s361_s13 }
  0x55   : > { %p1431_p4 = scmp.ne.s32.totalorder %s361_s13, %s1430_s27  ;;  %p1439_p10 = scmp.lt.s32.totalorder %s1430_s27, %s1430_s27 }
  0x57   : > { %p1433_p7 = pnand %p1431_p4, %p1765_p8  ;;  %p1440_p3 = por %p1439_p10, %p1438_p5 }
  0x59   : > { %p1434_p9 = pneg %p1433_p7 }
  0x5b   : > { %p1441_p1 = pnand %p1440_p3, %p1434_p9 }
  0x5d   : > { %1444 = shalt.err (!%p1441_p1)
}
  0x5e   : > { %1268 = dma.hbm_to_vmem [thread:$0]  (!%p1749_p6), %s2113_s6, 512, %s361_s13, [#allocation8], %s1630_s14, %s1630_s14, %s1631_s15  }
  0x5f   : > { %s1632_s4 = smov [#allocation12]   ;;  %s1445_s26 = scalar_lea.hbm %s2115_s8, 512 }
  0x60   : > { %s386_s9 = sshll.u32 %s1632_s4, 4  ;;  %p1446_p1 = scmp.ne.s32.totalorder %s2115_s8, %s1445_s26  ;;  %s387_s9 = int_to_ptr.vmem [resolvable:$true] %s386_s9 }
  0x61   : > { %p1452_p12 = scmp.lt.u32.totalorder %s1445_s26, %s2115_s8 }
  0x62   : > { %p1448_p3 = pnand %p1446_p1, %p1765_p8 }
  0x64   : > { %p1449_p11 = pneg %p1448_p3 }
  0x66   : > { %p1454_p13 = pnand %p1452_p12, %p1449_p11 }
  0x68   : > { %1457 = shalt.err (!%p1454_p13)
}
  0x69   : > { %s1458_s13 = scalar_lea.vmem %s387_s9, 512  ;;  %p1466_p7 = scmp.lt.s32.totalorder %s387_s9, %s387_s9 }
  0x6a   : > { %p1459_p0 = scmp.ne.s32.totalorder %s387_s9, %s1458_s13  ;;  %p1467_p9 = scmp.lt.s32.totalorder %s1458_s13, %s1458_s13 }
  0x6c   : > { %p1461_p2 = pnand %p1459_p0, %p1765_p8  ;;  %p1468_p5 = por %p1467_p9, %p1466_p7 }
  0x6e   : > { %p1462_p4 = pneg %p1461_p2 }
  0x70   : > { %p1469_p10 = pnand %p1468_p5, %p1462_p4 }
  0x72   : > { %1472 = shalt.err (!%p1469_p10)
}
  0x73   : > { %1274 = dma.hbm_to_vmem [thread:$0]  (!%p1749_p6), %s2115_s8, 512, %s387_s9, [#allocation11], %s1630_s14, %s1630_s14, %s1631_s15  }
  0x74   : > { %s1124_s10 = sadd.s32 4294967294, %s1625_s22   ;;  %s45_s28 = sadd.s32 1, %s1621_s21 }
  0x75   : > { %p47_p8 = scmp.ge.s32.totalorder %s45_s28, 2  ;;  %s54_s4 = sadd.s32 1, %s1613_s19 }
  0x76   : > { %p61_p1 = scmp.ne.s32.totalorder %s1613_s19, %s1609_s18  ;;  %p62_p3 = scmp.eq.s32.totalorder %s1625_s22, 0 }
  0x77   : > { %s2160_s28 = smov (%p47_p8, %s45_s28), 0  ;;  %p67_p12 = scmp.ne.s32.totalorder %s1609_s18, %s1605_s17 }
  0x78   : > { %p1866_p11 = por %p62_p3, %p61_p1  ;;  %s49_s14 = ssub.s32 %s1621_s21, %s2160_s28 }
  0x79   : > { %s2138_s15 = sadd.s32 4294967295, %s1625_s22   ;;  %p52_p13 = scmp.eq.s32.totalorder %s49_s14, 0 }
  0x7a   : > { %p287_p6 = scmp.eq.s32.totalorder %s2138_s15, 1  ;;  %p2139_p0 = scmp.ne.s32.totalorder %s2132_s24, 0 }
  0x7b   : > { %p293_p7 = scmp.eq.s32.totalorder %s1124_s10, 1  ;;  %p1290_p5 = scmp.lt.s32.totalorder %s1625_s22, 2 }
  0x7c   : > { %p1878_p2 = por %p2139_p0, %p67_p12  ;;  %p1882_p4 = por %p287_p6, %p61_p1 }
  0x7d   : > { %s1887_s26 = scalar_select %p52_p13, %s1613_s19, %s54_s4  }
  0x7e   : > { %s2141_s16 = scalar_select %p1882_p4, 1, 0 }
  0x7f   : > { %p1889_p9 = por %p293_p7, %p67_p12  ;;  %s403_s12 = sand.u32 1, %s1613_s19  }
  0x80   : > { %s1132_s23 = sshll.u32 %s1621_s21, 7  ;;  %s1131_s27 = sshll.u32 %s403_s12, 3 }
  0x81   : > { %s2142_s29 = scalar_select %p1889_p9, 1, 0 }
  0x82   : > { %s1899_s2 = scalar_lea.hbm %s2107_s0, %s1132_s23  ;;  %s407_s10 = scalar_lea.vmem [#allocation4], %s1131_s27 }
  0x83   : > { %s415_s4 = sshll.u32 %s407_s10, 4  ;;  %p1903_p10 = pnand %p1290_p5, %p1866_p11  ;;  %s1907_s4 = int_to_ptr.vmem [resolvable:$true] %s415_s4 }
  0x84   : > { %s404_s15 = scalar_lea.sflag [#allocation5], %s403_s12  ;;  %s1473_s5 = scalar_lea.hbm %s1899_s2, 128 }
  0x85   : > { %p1474_p8 = scmp.ne.s32.totalorder %s1899_s2, %s1473_s5  ;;  %p1475_p1 = pneg %p1903_p10 }
  0x86   : > { %s1478_s11 = scalar_lea.hbm %s2107_s0, 256  ;;  %p1479_p11 = scmp.lt.u32.totalorder %s1899_s2, %s2107_s0 }
  0x87   : > { %p1476_p3 = pnand %p1475_p1, %p1474_p8  ;;  %p1480_p6 = scmp.lt.u32.totalorder %s1478_s11, %s1473_s5 }
  0x88   : > { %p1482_p0 = scmp.lt.u32.totalorder %s1473_s5, %s1899_s2 }
  0x89   : > { %p1477_p12 = pneg %p1476_p3  ;;  %p1481_p13 = por %p1480_p6, %p1479_p11 }
  0x8b   : > { %p1483_p7 = por %p1482_p0, %p1481_p13 }
  0x8d   : > { %p1484_p5 = pnand %p1483_p7, %p1477_p12 }
  0x8f   : > { %1487 = shalt.err (!%p1484_p5)
}
  0x90   : > { %s1488_s12 = scalar_lea.vmem %s1907_s4, 128  ;;  %s1633_s10 = smov [#allocation4]  }
  0x91   : > { %p1489_p8 = scmp.ne.s32.totalorder %s1907_s4, %s1488_s12  ;;  %s1493_s23 = sshll.u32 %s1633_s10, 4  ;;  %s1494_s23 = int_to_ptr.vmem [resolvable:$false] %s1493_s23 }
  0x92   : > { %s1495_s27 = scalar_lea.vmem %s1494_s23, 256  ;;  %p1496_p4 = scmp.lt.s32.totalorder %s1907_s4, %s1494_s23 }
  0x93   : > { %p1491_p3 = pnand %p1489_p8, %p1475_p1  ;;  %p1497_p11 = scmp.lt.s32.totalorder %s1495_s27, %s1488_s12 }
  0x95   : > { %p1492_p9 = pneg %p1491_p3  ;;  %p1498_p6 = por %p1497_p11, %p1496_p4 }
  0x97   : > { %p1499_p13 = pnand %p1498_p6, %p1492_p9 }
  0x99   : > { %1502 = shalt.err (!%p1499_p13)
}
  0x9a   : > { %1278 = dma.hbm_to_vmem [thread:$0]  (!%p1903_p10), %s1899_s2, 128, %s1907_s4, %s404_s15  }
  0x9b   : > { %p2144_p12 = scmp.ne.s32.totalorder %s2133_s25, 0 }
  0x9c   : > { %s1937_s5 = sand.u32 (!%p2144_p12), 1, %s1609_s18  }
  0x9d   : > { %430 = sbr.rel (%p2144_p12) target bundleno = 669 (0x29d), region = 60  ;;  %s1134_s11 = sshll.u32 (!%p2144_p12), %s1937_s5, 3 }
  0x9e   : > { %s433_s13 = scalar_lea.sflag (!%p2144_p12), [#allocation5], %s1937_s5  ;;  %s1943_s30 = scalar_lea.vmem (!%p2144_p12), [#allocation4], %s1134_s11 }
  0xa4   : > { %1584 = dma.done.wait (%p1878_p2), %s433_s13, 128  }
  0xa5   : > { %1586 = vsyncadd (%p1878_p2), %s433_s13, 4294967168  ;;  %p2145_p4 = scmp.ne.s32.totalorder %s2132_s24, 0 }
  0xa7   : > { %1588 = dma.done.wait (%p2145_p4), [#allocation8], 1024  }
  0xa8   : > { %1590 = vsyncadd (%p2145_p4), [#allocation8], 4294966272 }
  0xa9   : > { %1592 = dma.done.wait (%p2145_p4), [#allocation11], 1024  }
  0xaa   : > { %1594 = vsyncadd (%p2145_p4), [#allocation11], 4294966272  ;;  %p498_p9 = scmp.lt.s32.totalorder %s1617_s20, 1  ;;  %v1634_v0 = vmov 0.0|0.0   ;;  %vm1635_vm0 = vmmov 0   ;;  %v1636_v1 = vmov 0.0   ;;  %v518_v2 = vlaneseq }
  0xab   : > { %1222 = vmatprep.subr.bf16.mxu1 %v1634_v0  ;;  %1216 = vmatprep.subr.bf16.mxu0 %v1634_v0  ;;  %v646_v3 = vld [vmem:[#allocation9] sm:$0xff]  ;;  %v647_v4 = vld [vmem:[#allocation9 + $0x8] sm:$0xff]  ;;  %vm506_vm1 = vcmask 253952   ;;  %v648_v8 = vld [vmem:[#allocation9 + $0x10] sm:$0xff]  ;;  %s2146_s10 = sld [smem:[#allocation21_spill]]  ;;  %s2147_s13 = sld [smem:[#allocation22_spill]] }
  0xac   : > { %1191 = vmatprep.mubr.msk.f32.mxu1 %vm1635_vm0, %v1636_v1  ;;  %s499_s25 = scalar_select %p498_p9, %s1617_s20, 1  ;;  %1180 = vmatprep.mubr.msk.f32.mxu0 %vm1635_vm0, %v1636_v1  ;;  %v562_v5 = vld [vmem:[#allocation7] sm:$0xff]  ;;  %v1223_v6 = vpack.c.bf16 %v647_v4, %v646_v3  ;;  %v563_v7 = vld [vmem:[#allocation7 + $0x8] sm:$0xff]  ;;  %v649_v9 = vld [vmem:[#allocation9 + $0x18] sm:$0xff]  ;;  %v1968_v12 = vshrl.u32 %v518_v2, 7  ;;  %vm566_vm3 = vcmask 261120  }
  0xad   : > { %v1217_v10 = vpack.c.bf16 %v563_v7, %v562_v5  ;;  %v542_v13 = vld [vmem:[%s2110_s3] sm:$0x1]  ;;  %v1226_v14 = vpack.c.bf16 %v649_v9, %v648_v8  ;;  %v564_v15 = vld [vmem:[#allocation7 + $0x10] sm:$0xff]  ;;  %v565_v16 = vld [vmem:[#allocation7 + $0x18] sm:$0xff]  ;;  %vm512_vm4 = vcmask 261127   ;;  %s2148_s24 = sld [smem:[#allocation24_spill]] }
  0xae   : > { %s500_s2 = scalar_lea.vmem %s2108_s1, %s499_s25  ;;  %1224 = vmatpush3.bf16.msra.mxu1 %v1223_v6  ;;  %v1978_v18 = vld [vmem:[%s1943_s30] sm:$0xff]  ;;  %v1220_v19 = vpack.c.bf16 %v565_v16, %v564_v15  ;;  %v1982_v20 = vsub.s32 0, %v1968_v12  ;;  %v543_v21 = vsub.f32 1.0, %v542_v13  ;;  %vm520_vm2 = vcmp.eq.s32.totalorder %v1968_v12, 0  ;;  %v725_v31 = vld [vmem:[#allocation10] sm:$0xff]  ;;  %v726_v32 = vld [vmem:[#allocation10 + $0x8] sm:$0xff] }
  0xaf   : > { %v505_v11 = vld [vmem:[%s500_s2] sm:$0x1]  ;;  %1225 = vmatprep.subr.bf16.mxu1 %v1634_v0  ;;  %1218 = vmatpush3.bf16.msra.mxu0 %v1217_v10  ;;  %v521_v23 = vrot.slane %v1978_v18, 7  ;;  %v1229_v36 = vpack.c.bf16 %v726_v32, %v725_v31  ;;  %v727_v39 = vld [vmem:[#allocation10 + $0x10] sm:$0xff]  ;;  %v728_v40 = vld [vmem:[#allocation10 + $0x18] sm:$0xff]  ;;  %vm822_vm5 = vcmp.ge.s32.totalorder %v1968_v12, 1 }
  0xb0   : > { %508 = vst.msk [vmem:[#allocation3] sm:$0x1] %vm506_vm1, %v505_v11  ;;  %507 = vst.msk [vmem:[#allocation2] sm:$0x1] %vm506_vm1, %v505_v11  ;;  %1219 = vmatprep.subr.bf16.mxu0 %v1634_v0  ;;  %v548_v26 = vrot.slane %v543_v21, %v1982_v20  ;;  %v1232_v42 = vpack.c.bf16 %v728_v40, %v727_v39  ;;  %v858_v44 = vld [vmem:[#allocation12] sm:$0xff]  ;;  %v859_v45 = vld [vmem:[#allocation12 + $0x8] sm:$0xff] }
  0xb1   : > { %v532_v17 = vld [vmem:[%s2146_s10] sm:$0x1]  ;;  %v1235_v46 = vpack.c.bf16 %v859_v45, %v858_v44  ;;  %v860_v47 = vld [vmem:[#allocation12 + $0x10] sm:$0xff]  ;;  %v861_v48 = vld [vmem:[#allocation12 + $0x18] sm:$0xff]  ;;  %vm830_vm6 = vcmp.ge.s32.totalorder %v1968_v12, 2  ;;  %vm844_vm7 = vcmp.ge.s32.totalorder %v1968_v12, 4 }
  0xb2   : > { %v533_v22 = vsub.f32 1.0, %v532_v17  ;;  %1227 = vmatpush3.bf16.msra.mxu1 %v1226_v14  ;;  %v552_v24 = vld [vmem:[%s2147_s13] sm:$0x1]  ;;  %v1238_v49 = vpack.c.bf16 %v861_v48, %v860_v47  ;;  %s497_s9 = scalar_lea.vmem [#allocation14], %s1937_s5  ;;  %s1149_s2 = sshll.u32 %s1617_s20, 4 }
  0xb3   : > { %1221 = vmatpush3.bf16.msra.mxu0 %v1220_v19  ;;  %1234 = vmatprep.subr.bf16.mxu1 %v1634_v0  ;;  %v553_v28 = vsub.f32 1.0, %v552_v24  ;;  %v802_v50 = vld [vmem:[%s2148_s24] sm:$0x1]  ;;  %517 = vst.msk [vmem:[%s497_s9 - $0x7] sm:$0x80] %vm512_vm4, %v1978_v18  ;;  %s968_s4 = sshll.u32 %s497_s9, 4  ;;  %s969_s4 = int_to_ptr.vmem [resolvable:$true] %s968_s4 }
  0xb4   : > { %1228 = vmatprep.subr.bf16.mxu0 %v1634_v0  ;;  %v538_v27 = vrot.slane %v533_v22, %v1982_v20  ;;  %v803_v51 = vmul.f32 1.442695, %v802_v50  ;;  %s2149_s12 = sld [smem:[#allocation26_spill]]  ;;  %s942_s23 = scalar_lea.sflag [#allocation15], %s1937_s5 }
  0xb5   : > { %v558_v35 = vrot.slane %v553_v28, %v1982_v20  ;;  %s1503_s27 = scalar_lea.vmem %s969_s4, 16  ;;  %p2150_p10 = scmp.ne.s32.totalorder %s2141_s16, 0 }
  0xb6   : > { %1353 = vpow2.f32 %v803_v51  ;;  %p1504_p2 = scmp.ne.s32.totalorder %s969_s4, %s1503_s27  ;;  %s1637_s13 = smov [#allocation14]  }
  0xb7   : > { %v1140_v25 = vld [vmem:[#allocation3] ss:$0 sm:$0xff]  ;;  %v1145_v59 = vld [vmem:[#allocation2] ss:$0 sm:$0xff]  ;;  %s1507_s30 = sshll.u32 %s1637_s13, 4  ;;  %s1508_s30 = int_to_ptr.vmem [resolvable:$false] %s1507_s30 }
  0xb8   : > { %v530_v29 = vsel %vm520_vm2, %v1140_v25, %v521_v23  ;;  %513 = vst.msk [vmem:[#allocation3 - $0x7] sm:$0x80] %vm512_vm4, %v1978_v18  ;;  %p1505_p1 = pnand %p1504_p2, %p2150_p10  ;;  %s1509_s25 = scalar_lea.vmem %s1508_s30, 32 }
  0xb9   : > { %v531_v30 = vsub.f32 %v530_v29, %v1978_v18  ;;  %p1510_p7 = scmp.lt.s32.totalorder %s969_s4, %s1508_s30  ;;  %p1511_p5 = scmp.lt.s32.totalorder %s1509_s25, %s1503_s27 }
  0xba   : > { %s2031_s10 = scalar_lea.hbm %s2149_s12, %s1149_s2  ;;  %p1506_p0 = pneg %p1505_p1 }
  0xbb   : > { %v550_v33 = vmul.f32 %v548_v26, %v531_v30  ;;  %v540_v34 = vmul.f32 %v538_v27, %v531_v30  ;;  %v560_v41 = vmul.f32 %v558_v35, %v531_v30  ;;  %p1512_p8 = por %p1511_p5, %p1510_p7 }
  0xbd   : > { %v551_v37 = vadd.f32 %v550_v33, %v1978_v18  ;;  %v541_v38 = vadd.f32 %v540_v34, %v1978_v18  ;;  %v561_v43 = vadd.f32 %v560_v41, %v1978_v18  ;;  %p1513_p3 = pnand %p1512_p8, %p1506_p0 }
  0xbf   : > { %1192 = vmatmul.mubr.msk.f32.vlgmr.msra.gmra.mrb[0].mxu1 %vm566_vm3, %v551_v37  ;;  %1181 = vmatmul.mubr.msk.f32.vlgmr.msra.gmra.mrb[0].mxu0 %vm566_vm3, %v541_v38 }
  0xc0   : > { %1230 = vmatpush3.bf16.msra.mxu0 %v1229_v36  ;;  %1202 = vmatprep.mubr.msk.f32.mxu0 %vm1635_vm0, %v1636_v1  ;;  %v1354_v57 = vpop.eup %1353 }
  0xc1   : > { %1231 = vmatprep.subr.bf16.mxu0 %v1634_v0  ;;  %1213 = vmatprep.mubr.msk.f32.mxu1 %vm1635_vm0, %v1636_v1  ;;  %v816_v58 = vrot.slane %v1354_v57, %v1982_v20  ;;  %v828_v5 = vmul.f32 %v1354_v57, %v1354_v57 }
  0xc2   : > { %1236 = vmatpush3.bf16.msra.mxu1 %v1235_v46 }
  0xc3   : > { %1237 = vmatprep.subr.bf16.mxu1 %v1634_v0  ;;  %v818_v62 = vmul.f32 %v1145_v59, %v816_v58  ;;  %v835_v10 = vrot.slane %v828_v5, %v1982_v20  ;;  %v842_v14 = vmul.f32 %v828_v5, %v828_v5 }
  0xc4   : > { %1233 = vmatpush3.bf16.msra.mxu0 %v1232_v42 }
  0xc5   : > { %v819_v1 = vsel %vm520_vm2, %v818_v62, 0.0  ;;  %v849_v19 = vrot.slane %v842_v14, %v1982_v20 }
  0xc6   : > { %1239 = vmatpush3.bf16.msra.mxu1 %v1238_v49 }
  0xc7   : > { %1203 = vmatmul.mubr.msk.f32.vlgmr.msra.gmra.mrb[2].mxu0 %vm566_vm3, %v561_v43 }
 0x192   : > { %v719_v52 = vpop.f32.mrb[0].mxu1  ;;  %v636_v53 = vpop.f32.mrb[0].mxu0 }
 0x193   : > { %v723_v54 = vmul.f32 1.442695, %v719_v52  ;;  %v1193_v55 = vpop.f32.mrb[1].mxu1  ;;  %v1182_v56 = vpop.f32.mrb[1].mxu0  ;;  %v1142_v60 = vmul.f32 -1.442695, %v636_v53 }
 0x195   : > { %1355 = vpow2.f32 %v723_v54 }
 0x196   : > { %1357 = vpow2.f32 %v1142_v60 }
 0x19a   : > { %v798_v61 = vpop.f32.mrb[2].mxu0 }
 0x19b   : > { %v1204_v63 = vpop.f32.mrb[3].mxu0 }
 0x19f   : > { %v1356_v0 = vpop.eup %1355 }
 0x1a0   : > { %v805_v2 = vmul.f32 %v1356_v0, %v798_v61  ;;  %v1358_v7 = vpop.eup %1357 }
 0x1a1   : > { %v643_v11 = vadd.f32 1.0, %v1358_v7 }
 0x1a2   : > { %v820_v3 = vadd.f32 %v819_v1, %v805_v2 }
 0x1a3   : > { %1359 = vrcp.f32 %v643_v11 }
 0x1a4   : > { %v821_v4 = vrot.slane %v820_v3, 7 }
 0x1a6   : > { %v823_v6 = vmul.f32 %v821_v4, %v816_v58 }
 0x1a8   : > { %v826_v8 = vsel %vm822_vm5, %v823_v6, 0.0 }
 0x1a9   : > { %v827_v9 = vadd.f32 %v826_v8, %v820_v3 }
 0x1ab   : > { %v829_v13 = vrot.slane %v827_v9, 6 }
 0x1ad   : > { %v837_v15 = vmul.f32 %v835_v10, %v829_v13  ;;  %v1360_v25 = vpop.eup %1359 }
 0x1af   : > { %v840_v16 = vsel %vm830_vm6, %v837_v15, 0.0 }
 0x1b0   : > { %v841_v17 = vadd.f32 %v840_v16, %v827_v9 }
 0x1b2   : > { %v843_v21 = vrot.slane %v841_v17, 4 }
 0x1b4   : > { %v851_v22 = vmul.f32 %v849_v19, %v843_v21 }
 0x1b6   : > { %v854_v23 = vsel %vm844_vm7, %v851_v22, 0.0 }
 0x1b7   : > { %v855_v24 = vadd.f32 %v854_v23, %v841_v17 }
 0x1b9   : > { %v857_v26 = vmul.f32 %v1360_v25, %v855_v24  ;;  %856 = vst.msk [vmem:[#allocation2 - $0x7] sm:$0x80] %vm512_vm4, %v855_v24 }
 0x1bb   : > { %1214 = vmatmul.mubr.msk.f32.vlgmr.msra.gmra.mrb[2].mxu1 %vm566_vm3, %v857_v26 }
 0x1bc   : > { %1516 = shalt.err (!%p1513_p3)
}
 0x1bd   : > { %s1517_s24 = scalar_lea.hbm %s2031_s10, 16  ;;  %s1521_s14 = scalar_lea.hbm %s2149_s12, 32 }
 0x1be   : > { %p1518_p11 = scmp.ne.s32.totalorder %s2031_s10, %s1517_s24  ;;  %p1522_p12 = scmp.lt.u32.totalorder %s2031_s10, %s2149_s12 }
 0x1bf   : > { %p1523_p4 = scmp.lt.u32.totalorder %s1521_s14, %s1517_s24  ;;  %p1525_p2 = scmp.lt.u32.totalorder %s1517_s24, %s2031_s10 }
 0x1c0   : > { %p1519_p6 = pnand %p1518_p11, %p2150_p10 }
 0x1c1   : > { %p1524_p9 = por %p1523_p4, %p1522_p12 }
 0x1c2   : > { %p1520_p13 = pneg %p1519_p6 }
 0x1c3   : > { %p1526_p1 = por %p1525_p2, %p1524_p9 }
 0x1c5   : > { %p1527_p0 = pnand %p1526_p1, %p1520_p13 }
 0x1c7   : > { %1530 = shalt.err (!%p1527_p0)
}
 0x1c8   : > { %1259 = dma.vmem_to_hbm [thread:$0]  (%p2150_p10), %s969_s4, 16, %s2031_s10, %s942_s23  }
 0x1c9   : > { %s1148_s27 = sshll.u32 %s1617_s20, 7  ;;  %s491_s30 = scalar_lea.vmem [#allocation13], %s1134_s11 }
 0x1ca   : > { %s955_s25 = sshll.u32 %s491_s30, 4  ;;  %s2151_s14 = sld [smem:[#allocation25_spill]]  ;;  %s2059_s25 = int_to_ptr.vmem [resolvable:$true] %s955_s25 }
 0x1cb   : > { %s937_s24 = scalar_lea.sflag [#allocation6], %s1937_s5  ;;  %s1531_s4 = scalar_lea.vmem %s2059_s25, 128 }
 0x1cc   : > { %p1532_p7 = scmp.ne.s32.totalorder %s2059_s25, %s1531_s4  ;;  %s1638_s20 = smov [#allocation13]  }
 0x1cd   : > { %s1535_s11 = sshll.u32 %s1638_s20, 4  ;;  %s1536_s11 = int_to_ptr.vmem [resolvable:$false] %s1535_s11 }
 0x1ce   : > { %p1533_p5 = pnand %p1532_p7, %p2150_p10  ;;  %s1537_s10 = scalar_lea.vmem %s1536_s11, 256 }
 0x1cf   : > { %p1538_p3 = scmp.lt.s32.totalorder %s2059_s25, %s1536_s11  ;;  %p1539_p11 = scmp.lt.s32.totalorder %s1537_s10, %s1531_s4 }
 0x1d0   : > { %s2057_s15 = scalar_lea.hbm %s2151_s14, %s1148_s27  ;;  %p1534_p8 = pneg %p1533_p5 }
 0x1d1   : > { %p1540_p6 = por %p1539_p11, %p1538_p3 }
 0x1d3   : > { %p1541_p13 = pnand %p1540_p6, %p1534_p8 }
 0x28e   : > { %v931_v12 = vpop.f32.mrb[2].mxu1 }
 0x28f   : > { %935 = vst.msk [vmem:[%s491_s30] sm:$0xff] %vm566_vm3, %v931_v12  ;;  %v1215_v18 = vpop.f32.mrb[3].mxu1 }
 0x290   : > { %1544 = shalt.err (!%p1541_p13)
}
 0x291   : > { %s1545_s5 = scalar_lea.hbm %s2057_s15, 128  ;;  %s1549_s27 = scalar_lea.hbm %s2151_s14, 256 }
 0x292   : > { %p1546_p12 = scmp.ne.s32.totalorder %s2057_s15, %s1545_s5  ;;  %p1550_p2 = scmp.lt.u32.totalorder %s2057_s15, %s2151_s14 }
 0x293   : > { %p1551_p1 = scmp.lt.u32.totalorder %s1549_s27, %s1545_s5  ;;  %p1553_p7 = scmp.lt.u32.totalorder %s1545_s5, %s2057_s15 }
 0x294   : > { %p1547_p4 = pnand %p1546_p12, %p2150_p10 }
 0x295   : > { %p1552_p0 = por %p1551_p1, %p1550_p2 }
 0x296   : > { %p1548_p9 = pneg %p1547_p4 }
 0x297   : > { %p1554_p5 = por %p1553_p7, %p1552_p0 }
 0x299   : > { %p1555_p8 = pnand %p1554_p5, %p1548_p9 }
 0x29b   : > { %1558 = shalt.err (!%p1555_p8)
}
 0x29c   : > { %1258 = dma.vmem_to_hbm [thread:$0]  (%p2150_p10), %s2059_s25, 128, %s2057_s15, %s937_s24  }
 0x29d PF: > { %s980_s2 = sand.u32 1, %s1605_s17   ;;  %p2152_p3 = scmp.ne.s32.totalorder %s2142_s29, 0 }
 0x29e   : > { %p2153_p11 = scmp.ge.s32.totalorder %s1625_s22, 2  ;;  %s981_s4 = scalar_lea.sflag [#allocation6], %s980_s2 }
 0x2a0   : > { %p1280_p6 = pnand %p2153_p11, %p2152_p3 }
 0x2a2   : > { %1596 = dma.done.wait (!%p1280_p6), %s981_s4, 128  }
 0x2a3   : > { %1598 = vsyncadd (!%p1280_p6), %s981_s4, 4294967168  ;;  %s990_s20 = scalar_lea.sflag [#allocation15], %s980_s2 }
 0x2a4   : > { %1600 = dma.done.wait (!%p1280_p6), %s990_s20, 16  }
 0x2a5   : > { %1602 = vsyncadd (!%p1280_p6), %s990_s20, 4294967280  ;;  %s33_s22 = sadd.s32 1, %s1625_s22   ;;  %s2154_s17 = smov %s1609_s18 }
 0x2a6   : > { %p30_p13 = scmp.ge.s32.totalorder %s33_s22, 4   ;;  %s2155_s18 = smov %s1613_s19 }
 0x2a7   : > { %s2156_s19 = smov %s1887_s26  ;;  %s2157_s20 = smov %s1621_s21 }
 0x2a8   : > { %s2158_s21 = smov %s2160_s28  ;;  %32 = sbr.rel (!%p30_p13) target bundleno = 17 (0x11), region = 149 }
 0x2af   :  { %994 = vsyncpa [#allocation5], 1 }
 0x2b0   :  { %996 = vsyncpa [#allocation5 + $0x1], 1 }
 0x2b1   :  { %997 = vsyncpa [#allocation8], 1 }
 0x2b2   :  { %998 = vsyncpa [#allocation11], 1 }
 0x2b3   :  { %999 = vsyncpa [#allocation6], 1 }
 0x2b4   :  { %1001 = vsyncpa [#allocation6 + $0x1], 1 }
 0x2b5   :  { %1002 = vsyncpa [#allocation15], 1 }
 0x2b6   :  { %1004 = vsyncpa [#allocation15 + $0x1], 1 }

</bundles_post_ra>
